<compile_context>
chip_gen: v5e
topology: v5e:2x2
jax: 0.10.0
libtpu: 0.0.40
codegen_flags: <defaults>
</compile_context>

<pallas_src>
import math

import jax
import jax.numpy as jnp
from jax.experimental import pallas as pl
from jax.experimental.pallas import tpu as pltpu

LANE = 128      # lane-padded OUTPUT feature width (hidden/2 and out_dim <= 128)
BN_EPS = 1e-5


# ----------------------------- glue (plain JAX) -----------------------------

def _round_up(a, b):
    return ((a + b - 1) // b) * b


def build_adjacency(edge_index, num_nodes):
    """Dense edge-count matrix A[i, j] = #edges j -> i, and per-row 1/in_deg.

    (A @ x) * inv_deg[:, None] is then the PyG mean aggregation
    (0 for isolated nodes, like scatter_mean)."""
    src, dst = edge_index[0], edge_index[1]
    counts = jnp.zeros((num_nodes, num_nodes), jnp.float32).at[dst, src].add(1.0)
    deg = counts.sum(axis=1)
    inv_deg = jnp.where(deg > 0, 1.0 / deg, 0.0)
    return counts, inv_deg


def pad2d(a, rows, cols):
    r, c = a.shape
    return jnp.pad(a, ((0, rows - r), (0, cols - c)))


def fuse_layer_params(w_l, b_l, w_r, gamma, beta, rmean, rvar, f_in_pad, f_out_pad):
    """Pad W_l / W_r and fold lin_l bias + inference-mode BatchNorm into a
    per-feature scale/shift."""
    din, dout = w_l.shape
    wl_p = jnp.zeros((f_in_pad, f_out_pad), jnp.float32).at[:din, :dout].set(w_l)
    wr_p = jnp.zeros((f_in_pad, f_out_pad), jnp.float32).at[:din, :dout].set(w_r)
    scale = gamma / jnp.sqrt(rvar + BN_EPS)
    shift = beta + (b_l - rmean) * scale
    scale_p = jnp.zeros((1, f_out_pad), jnp.float32).at[0, :dout].set(scale)
    shift_p = jnp.zeros((1, f_out_pad), jnp.float32).at[0, :dout].set(shift)
    return wl_p.astype(jnp.bfloat16), wr_p.astype(jnp.bfloat16), scale_p, shift_p


# ------------------------------- Pallas kernel -------------------------------

def sage_layer_kernel(adj_ref, xn_ref, xs_ref, invdeg_ref, wl_ref, wr_ref,
                      scale_ref, shift_ref, out_ref, acc_ref):
    """One SAGEConv + folded BatchNorm + ReLU, tiled over (row_tile, nbr_tile).

    acc_ref accumulates A_count_tile @ x_tile in f32 across the reduction axis;
    the mean normalization (f32 1/deg), the two linear matmuls, BN and ReLU run
    once at k == last."""
    k = pl.program_id(1)

    @pl.when(k == 0)
    def _():
        acc_ref[...] = jnp.zeros_like(acc_ref)

    # int8 0/1-count adjacency tile, widened to bf16 for the MXU (portable on
    # v5e / v6e / v7x); HBM stream is half the bf16 size.
    adj = adj_ref[...].astype(jnp.bfloat16)
    acc_ref[...] += jnp.dot(adj, xn_ref[...], preferred_element_type=jnp.float32)

    @pl.when(k == pl.num_programs(1) - 1)
    def _():
        # mean aggregation: per-row 1/deg applied in f32 (exact 0/1 structure
        # in HBM, no bf16 quantization of the mean weights).
        agg = (acc_ref[...] * invdeg_ref[...]).astype(jnp.bfloat16)
        # two K=f_in dots into one f32 accumulator (no concat materialization)
        y = jnp.dot(agg, wl_ref[...], preferred_element_type=jnp.float32)
        y = y + jnp.dot(xs_ref[...], wr_ref[...], preferred_element_type=jnp.float32)
        y = y * scale_ref[...] + shift_ref[...]      # lin_l bias + BN (folded)
        out_ref[...] = jnp.maximum(y, 0.0).astype(out_ref.dtype)


def sage_layer(adj, x, inv_deg, w_l, w_r, scale, shift, *, out_dtype, tm, tk):
    n = adj.shape[0]
    f_in = x.shape[1]
    f_out = w_l.shape[1]
    assert n % tm == 0 and n % tk == 0
    assert tm % 32 == 0 and tk % 128 == 0    # int8 adjacency (32, 128) tiling
    grid = (n // tm, n // tk)

    out_bytes = jnp.dtype(out_dtype).itemsize
    cost = pl.CostEstimate(
        flops=2 * n * n * f_in + 4 * n * f_in * f_out,
        transcendentals=0,
        bytes_accessed=(n * n * 1                       # int8 adjacency stream
                        + (n // tm) * n * f_in * 2      # neighbor-feature re-stream
                        + n * f_in * 2                  # self features
                        + n * f_out * out_bytes         # output
                        + n * 4),                       # 1/deg
    )

    return pl.pallas_call(
        sage_layer_kernel,
        out_shape=jax.ShapeDtypeStruct((n, f_out), out_dtype),
        grid_spec=pltpu.PrefetchScalarGridSpec(
            num_scalar_prefetch=0,
            grid=grid,
            in_specs=[
                pl.BlockSpec((tm, tk), lambda i, k: (i, k)),        # adjacency (int8)
                pl.BlockSpec((tk, f_in), lambda i, k: (k, 0)),      # neighbor feats
                pl.BlockSpec((tm, f_in), lambda i, k: (i, 0)),      # self feats
                pl.BlockSpec((tm, 1), lambda i, k: (i, 0)),         # 1/deg (f32)
                pl.BlockSpec((f_in, f_out), lambda i, k: (0, 0)),   # W_l
                pl.BlockSpec((f_in, f_out), lambda i, k: (0, 0)),   # W_r
                pl.BlockSpec((1, f_out), lambda i, k: (0, 0)),      # BN scale
                pl.BlockSpec((1, f_out), lambda i, k: (0, 0)),      # BN shift
            ],
            out_specs=pl.BlockSpec((tm, f_out), lambda i, k: (i, 0)),
            scratch_shapes=[pltpu.VMEM((tm, f_in), jnp.float32)],
        ),
        compiler_params=pltpu.CompilerParams(
            dimension_semantics=("parallel", "arbitrary")),
        cost_estimate=cost,
    )(adj, x, x, inv_deg, w_l, w_r, scale, shift)


def graphsage_node_forward(x, edge_index, params, *, tm=512, tk=512):
    n, f_in = x.shape
    out_dim = params["w_l2"].shape[1]

    # Clamp tiles to the padded graph size (small test graphs) while keeping
    # the int8 tiling constraints (tm % 32, tk % 128); pad N to lcm(tm, tk).
    cap = _round_up(n, 256)
    tm = min(tm, cap)
    tk = min(tk, cap)
    n_pad = _round_up(n, math.lcm(tm, tk))

    adj_counts, inv_deg = build_adjacency(edge_index, n)
    a_pad = pad2d(adj_counts, n_pad, n_pad).astype(jnp.int8)   # exact 0/1 counts
    inv_pad = jnp.pad(inv_deg, (0, n_pad - n)).reshape(n_pad, 1).astype(jnp.float32)

    # Layer 1: streamed features at natural width (no lane padding on x);
    # output lane-padded to 128 so stores are unmasked.
    x_pad = jnp.pad(x, ((0, n_pad - n), (0, 0))).astype(jnp.bfloat16)
    wl1, wr1, s1, t1 = fuse_layer_params(
        params["w_l1"], params["b_l1"], params["w_r1"],
        params["gamma1"], params["beta1"], params["mean1"], params["var1"],
        f_in, LANE)
    h = sage_layer(a_pad, x_pad, inv_pad, wl1, wr1, s1, t1,
                   out_dtype=jnp.bfloat16, tm=tm, tk=tk)

    # Layer 2: input is the lane-padded (zero-extended) layer-1 activations.
    wl2, wr2, s2, t2 = fuse_layer_params(
        params["w_l2"], params["b_l2"], params["w_r2"],
        params["gamma2"], params["beta2"], params["mean2"], params["var2"],
        LANE, LANE)
    out = sage_layer(a_pad, h, inv_pad, wl2, wr2, s2, t2,
                     out_dtype=jnp.float32, tm=tm, tk=tk)
    return out[:n, :out_dim]


# ------------------------------ parameter setup ------------------------------

def init_params(key, input_dim, hidden_dim, output_dim):
    h = hidden_dim // 2
    ks = jax.random.split(key, 14)

    def lin(k, fan_in, shape):
        bound = 1.0 / jnp.sqrt(jnp.float32(fan_in))
        return jax.random.uniform(k, shape, jnp.float32, -bound, bound)

    return dict(
        # SAGEConv 1 (input_dim -> hidden_dim/2): lin_l (bias), lin_r (no bias)
        w_l1=lin(ks[0], input_dim, (input_dim, h)),
        w_r1=lin(ks[1], input_dim, (input_dim, h)),
        b_l1=lin(ks[2], input_dim, (h,)),
        # SAGEConv 2 (hidden_dim/2 -> output_dim)
        w_l2=lin(ks[3], h, (h, output_dim)),
        w_r2=lin(ks[4], h, (h, output_dim)),
        b_l2=lin(ks[5], h, (output_dim,)),
        # BatchNorm1d params (inference mode, non-trivial to exercise the path)
        gamma1=1.0 + 0.1 * jax.random.normal(ks[6], (h,)),
        beta1=0.1 * jax.random.normal(ks[7], (h,)),
        mean1=0.05 * jax.random.normal(ks[8], (h,)),
        var1=jnp.abs(1.0 + 0.1 * jax.random.normal(ks[9], (h,))),
        gamma2=1.0 + 0.1 * jax.random.normal(ks[10], (output_dim,)),
        beta2=0.1 * jax.random.normal(ks[11], (output_dim,)),
        mean2=0.05 * jax.random.normal(ks[12], (output_dim,)),
        var2=jnp.abs(1.0 + 0.1 * jax.random.normal(ks[13], (output_dim,))),
    )


# ------------------------------ pure-JAX reference ----------------------------

def reference_forward(adj_counts, inv_deg, x, p):
    """Same math in plain JAX; inputs/weights quantized to bf16 to match the
    kernel's compute precision (aggregation and accumulation stay f32)."""
    bf = lambda a: a.astype(jnp.bfloat16).astype(jnp.float32)

    def bn(y, g, b, m, v):
        return (y - m) / jnp.sqrt(v + BN_EPS) * g + b

    xq = bf(x)
    agg1 = (adj_counts @ xq) * inv_deg[:, None]
    y1 = bf(agg1) @ bf(p["w_l1"]) + xq @ bf(p["w_r1"]) + p["b_l1"]
    y1 = jax.nn.relu(bn(y1, p["gamma1"], p["beta1"], p["mean1"], p["var1"]))
    y1 = bf(y1)  # layer-1 activations are bf16 between the two kernel calls
    agg2 = (adj_counts @ y1) * inv_deg[:, None]
    y2 = bf(agg2) @ bf(p["w_l2"]) + y1 @ bf(p["w_r2"]) + p["b_l2"]
    y2 = jax.nn.relu(bn(y2, p["gamma2"], p["beta2"], p["mean2"], p["var2"]))
    return y2


# ------------------------------------ main -----------------------------------

if __name__ == "__main__":
    key = jax.random.PRNGKey(0)
    k_x, k_edge, k_param = jax.random.split(key, 3)

    num_nodes = 200          # padded to 256 inside the wrapper
    num_edges = 800
    input_dim = 32
    hidden_dim = 64          # SAGEConv hidden = hidden_dim // 2 = 32
    output_dim = 32

    x = jax.random.normal(k_x, (num_nodes, input_dim), jnp.float32)
    k_src, k_dst = jax.random.split(k_edge)
    edge_index = jnp.stack([
        jax.random.randint(k_src, (num_edges,), 0, num_nodes),
        jax.random.randint(k_dst, (num_edges,), 0, num_nodes),
    ])

    params = init_params(k_param, input_dim, hidden_dim, output_dim)

    out = graphsage_node_forward(x, edge_index, params)
    out = jax.block_until_ready(out)

    adj_counts, inv_deg = build_adjacency(edge_index, num_nodes)
    ref = reference_forward(adj_counts, inv_deg, x, params)

    assert out.shape == (num_nodes, output_dim)
    max_diff = float(jnp.max(jnp.abs(out - ref)))
    assert jnp.allclose(out, ref, atol=3e-2, rtol=3e-2), f"max abs diff {max_diff}"

    print("KERNEL_OK")
</pallas_src>

<mosaic_0001>
module attributes {stable_mosaic.version = 11 : i64} {
  func.func @sage_layer_kernel(%arg0: i32, %arg1: i32, %arg2: memref<256x256xi8, #tpu.memory_space<vmem>>, %arg3: memref<256x32xbf16, #tpu.memory_space<vmem>>, %arg4: memref<256x32xbf16, #tpu.memory_space<vmem>>, %arg5: memref<256x1xf32, #tpu.memory_space<vmem>>, %arg6: memref<32x128xbf16, #tpu.memory_space<vmem>>, %arg7: memref<32x128xbf16, #tpu.memory_space<vmem>>, %arg8: memref<1x128xf32, #tpu.memory_space<vmem>>, %arg9: memref<1x128xf32, #tpu.memory_space<vmem>>, %arg10: memref<256x128xbf16, #tpu.memory_space<vmem>>, %arg11: memref<256x32xf32, #tpu.memory_space<vmem>>) attributes {dimension_semantics = [#tpu.dimension_semantics<parallel>, #tpu.dimension_semantics<arbitrary>], iteration_bounds = array<i64: 1, 1>, scalar_prefetch = 0 : i64, scratch_operands = 1 : i64, tpu.core_type = #tpu.core_type<tc>, window_params = [{transform_indices = @transform_0, window_bounds = array<i64: 256, 256>}, {transform_indices = @transform_1, window_bounds = array<i64: 256, 32>}, {transform_indices = @transform_2, window_bounds = array<i64: 256, 32>}, {transform_indices = @transform_3, window_bounds = array<i64: 256, 1>}, {pipeline_mode = #tpu.pipeline_mode<synchronous>, transform_indices = @transform_4, window_bounds = array<i64: 32, 128>}, {pipeline_mode = #tpu.pipeline_mode<synchronous>, transform_indices = @transform_5, window_bounds = array<i64: 32, 128>}, {pipeline_mode = #tpu.pipeline_mode<synchronous>, transform_indices = @transform_6, window_bounds = array<i64: 1, 128>}, {pipeline_mode = #tpu.pipeline_mode<synchronous>, transform_indices = @transform_7, window_bounds = array<i64: 1, 128>}, {transform_indices = @transform_8, window_bounds = array<i64: 256, 128>}]} {
    %c0_i32 = arith.constant 0 : i32
    %0 = arith.cmpi eq, %arg1, %c0_i32 : i32
    %1 = arith.extui %0 : i1 to i32
    %c0_i32_0 = arith.constant 0 : i32
    %2 = arith.cmpi ne, %1, %c0_i32_0 : i32
    scf.if %2 {
      %cst_10 = arith.constant 0.000000e+00 : f32
      %13 = vector.broadcast %cst_10 : f32 to vector<256x32xf32>
      %c0_11 = arith.constant 0 : index
      %c0_12 = arith.constant 0 : index
      %14 = vector.load %arg11[%c0_11, %c0_12] : memref<256x32xf32, #tpu.memory_space<vmem>>, vector<256x32xf32>
      tpu.vector_store %arg11[%c0_11, %c0_12], %13 {strides = array<i32>} : memref<256x32xf32, #tpu.memory_space<vmem>>, vector<256x32xf32>,
    } else {
    }
    %c0 = arith.constant 0 : index
    %c0_1 = arith.constant 0 : index
    %3 = vector.load %arg2[%c0, %c0_1] : memref<256x256xi8, #tpu.memory_space<vmem>>, vector<256x256xi8>
    %4 = arith.sitofp %3 : vector<256x256xi8> to vector<256x256xbf16>
    %c0_2 = arith.constant 0 : index
    %c0_3 = arith.constant 0 : index
    %5 = vector.load %arg11[%c0_2, %c0_3] : memref<256x32xf32, #tpu.memory_space<vmem>>, vector<256x32xf32>
    %c0_4 = arith.constant 0 : index
    %c0_5 = arith.constant 0 : index
    %6 = vector.load %arg3[%c0_4, %c0_5] : memref<256x32xbf16, #tpu.memory_space<vmem>>, vector<256x32xbf16>
    %cst = arith.constant dense<0.000000e+00> : vector<256x32xf32>
    %7 = tpu.matmul %4, %6, %cst {dimension_numbers = #tpu.dot_dimension_numbers<[1], [0], [0], [1], [0, 0, 1, 1], [], []>} : vector<256x256xbf16>, vector<256x32xbf16>, vector<256x32xf32> -> vector<256x32xf32>
    %8 = arith.addf %5, %7 : vector<256x32xf32>
    %c0_6 = arith.constant 0 : index
    %c0_7 = arith.constant 0 : index
    %9 = vector.load %arg11[%c0_6, %c0_7] : memref<256x32xf32, #tpu.memory_space<vmem>>, vector<256x32xf32>
    tpu.vector_store %arg11[%c0_6, %c0_7], %8 {strides = array<i32>} : memref<256x32xf32, #tpu.memory_space<vmem>>, vector<256x32xf32>,
    %c0_i32_8 = arith.constant 0 : i32
    %10 = arith.cmpi eq, %arg1, %c0_i32_8 : i32
    %11 = arith.extui %10 : i1 to i32
    %c0_i32_9 = arith.constant 0 : i32
    %12 = arith.cmpi ne, %11, %c0_i32_9 : i32
    scf.if %12 {
      %c0_10 = arith.constant 0 : index
      %c0_11 = arith.constant 0 : index
      %13 = vector.load %arg11[%c0_10, %c0_11] : memref<256x32xf32, #tpu.memory_space<vmem>>, vector<256x32xf32>
      %c0_12 = arith.constant 0 : index
      %c0_13 = arith.constant 0 : index
      %14 = vector.load %arg5[%c0_12, %c0_13] : memref<256x1xf32, #tpu.memory_space<vmem>>, vector<256x1xf32>
      %15 = vector.broadcast %14 : vector<256x1xf32> to vector<256x32xf32>
      %16 = arith.mulf %13, %15 : vector<256x32xf32>
      %17 = arith.truncf %16 : vector<256x32xf32> to vector<256x32xbf16>
      %c0_14 = arith.constant 0 : index
      %c0_15 = arith.constant 0 : index
      %18 = vector.load %arg6[%c0_14, %c0_15] : memref<32x128xbf16, #tpu.memory_space<vmem>>, vector<32x128xbf16>
      %cst_16 = arith.constant dense<0.000000e+00> : vector<256x128xf32>
      %19 = tpu.matmul %17, %18, %cst_16 {dimension_numbers = #tpu.dot_dimension_numbers<[1], [0], [0], [1], [0, 0, 1, 1], [], []>} : vector<256x32xbf16>, vector<32x128xbf16>, vector<256x128xf32> -> vector<256x128xf32>
      %c0_17 = arith.constant 0 : index
      %c0_18 = arith.constant 0 : index
      %20 = vector.load %arg4[%c0_17, %c0_18] : memref<256x32xbf16, #tpu.memory_space<vmem>>, vector<256x32xbf16>
      %c0_19 = arith.constant 0 : index
      %c0_20 = arith.constant 0 : index
      %21 = vector.load %arg7[%c0_19, %c0_20] : memref<32x128xbf16, #tpu.memory_space<vmem>>, vector<32x128xbf16>
      %cst_21 = arith.constant dense<0.000000e+00> : vector<256x128xf32>
      %22 = tpu.matmul %20, %21, %cst_21 {dimension_numbers = #tpu.dot_dimension_numbers<[1], [0], [0], [1], [0, 0, 1, 1], [], []>} : vector<256x32xbf16>, vector<32x128xbf16>, vector<256x128xf32> -> vector<256x128xf32>
      %23 = arith.addf %19, %22 : vector<256x128xf32>
      %c0_22 = arith.constant 0 : index
      %c0_23 = arith.constant 0 : index
      %24 = vector.load %arg8[%c0_22, %c0_23] : memref<1x128xf32, #tpu.memory_space<vmem>>, vector<1x128xf32>
      %25 = vector.broadcast %24 : vector<1x128xf32> to vector<256x128xf32>
      %26 = arith.mulf %23, %25 : vector<256x128xf32>
      %c0_24 = arith.constant 0 : index
      %c0_25 = arith.constant 0 : index
      %27 = vector.load %arg9[%c0_24, %c0_25] : memref<1x128xf32, #tpu.memory_space<vmem>>, vector<1x128xf32>
      %28 = vector.broadcast %27 : vector<1x128xf32> to vector<256x128xf32>
      %29 = arith.addf %26, %28 : vector<256x128xf32>
      %cst_26 = arith.constant 0.000000e+00 : f32
      %30 = vector.broadcast %cst_26 : f32 to vector<256x128xf32>
      %31 = arith.maximumf %29, %30 : vector<256x128xf32>
      %32 = arith.truncf %31 : vector<256x128xf32> to vector<256x128xbf16>
      %c0_27 = arith.constant 0 : index
      %c0_28 = arith.constant 0 : index
      %33 = vector.load %arg10[%c0_27, %c0_28] : memref<256x128xbf16, #tpu.memory_space<vmem>>, vector<256x128xbf16>
      tpu.vector_store %arg10[%c0_27, %c0_28], %32 {strides = array<i32>} : memref<256x128xbf16, #tpu.memory_space<vmem>>, vector<256x128xbf16>,
    } else {
    }
    return
  }
  func.func @transform_0(%arg0: i32, %arg1: i32) -> (i32, i32) {
    %c0_i32 = arith.constant 0 : i32
    return %arg0, %arg1 : i32, i32
  }
  func.func @transform_1(%arg0: i32, %arg1: i32) -> (i32, i32) {
    %c0_i32 = arith.constant 0 : i32
    %c0_i32_0 = arith.constant 0 : i32
    return %arg1, %c0_i32 : i32, i32
  }
  func.func @transform_2(%arg0: i32, %arg1: i32) -> (i32, i32) {
    %c0_i32 = arith.constant 0 : i32
    %c0_i32_0 = arith.constant 0 : i32
    return %arg0, %c0_i32 : i32, i32
  }
  func.func @transform_3(%arg0: i32, %arg1: i32) -> (i32, i32) {
    %c0_i32 = arith.constant 0 : i32
    %c0_i32_0 = arith.constant 0 : i32
    return %arg0, %c0_i32 : i32, i32
  }
  func.func @transform_4(%arg0: i32, %arg1: i32) -> (i32, i32) {
    %c0_i32 = arith.constant 0 : i32
    %c0_i32_0 = arith.constant 0 : i32
    %c0_i32_1 = arith.constant 0 : i32
    return %c0_i32, %c0_i32_0 : i32, i32
  }
  func.func @transform_5(%arg0: i32, %arg1: i32) -> (i32, i32) {
    %c0_i32 = arith.constant 0 : i32
    %c0_i32_0 = arith.constant 0 : i32
    %c0_i32_1 = arith.constant 0 : i32
    return %c0_i32, %c0_i32_0 : i32, i32
  }
  func.func @transform_6(%arg0: i32, %arg1: i32) -> (i32, i32) {
    %c0_i32 = arith.constant 0 : i32
    %c0_i32_0 = arith.constant 0 : i32
    %c0_i32_1 = arith.constant 0 : i32
    return %c0_i32, %c0_i32_0 : i32, i32
  }
  func.func @transform_7(%arg0: i32, %arg1: i32) -> (i32, i32) {
    %c0_i32 = arith.constant 0 : i32
    %c0_i32_0 = arith.constant 0 : i32
    %c0_i32_1 = arith.constant 0 : i32
    return %c0_i32, %c0_i32_0 : i32, i32
  }
  func.func @transform_8(%arg0: i32, %arg1: i32) -> (i32, i32) {
    %c0_i32 = arith.constant 0 : i32
    %c0_i32_0 = arith.constant 0 : i32
    return %arg0, %c0_i32 : i32, i32
  }
}

</mosaic_0001>

<bundles_post_ra>
// kernel: tpu_custom_call.1
= control target key start
LH: loop header
LB: loop body
LE: loop exit
PB: predicated region body
PF: predicated region fallthrough
CT: control target
= control target key end

     0   :  { %v1869_v3 = vmov 0   ;;  %s2418_s0 = inlined_call_operand.vmem [shape: s8[256,256], index: 0, kind: input, shape index: {}]   ;;  %s2419_s1 = inlined_call_operand.vmem [shape: bf16[256,32], index: 1, kind: input, shape index: {}]   ;;  %s2420_s2 = inlined_call_operand.vmem [shape: bf16[256,32], index: 2, kind: input, shape index: {}]   ;;  %s2421_s3 = inlined_call_operand.vmem [shape: f32[256,1], index: 3, kind: input, shape index: {}]   ;;  %s2422_s4 = inlined_call_operand.vmem [shape: bf16[32,128], index: 4, kind: input, shape index: {}]   ;;  %s2423_s5 = inlined_call_operand.vmem [shape: bf16[32,128], index: 5, kind: input, shape index: {}]   ;;  %s2424_s6 = inlined_call_operand.vmem [shape: f32[1,128], index: 6, kind: input, shape index: {}]   ;;  %s2425_s7 = inlined_call_operand.vmem [shape: f32[1,128], index: 7, kind: input, shape index: {}]   ;;  %s2426_s8 = inlined_call_operand.hbm [shape: bf16[256,128], index: 8, kind: output, shape index: {}]  }
   0x1   :  { %v684_v0 = vld [vmem:[%s2421_s3 + $0x10] sm:$0xff]  ;;  %v682_v1 = vld [vmem:[%s2421_s3] sm:$0xff]  ;;  %v1709_v2 = vld [vmem:[%s2419_s1 + $0x38] sm:$0xff]  ;;  %1839 = vset.pattern.permute.xlu1 %v1869_v3  ;;  %1838 = vset.pattern.permute.xlu0 %v1869_v3 }
   0x2   :  { %v1717_v4 = vld [vmem:[%s2419_s1 + $0x78] sm:$0xff]  ;;  %726 = vperm.xlu1 %1839, %v684_v0   ;;  %716 = vperm.xlu0 %1838, %v682_v1   ;;  %v1708_v5 = vld [vmem:[%s2419_s1 + $0x30] sm:$0xff]  ;;  %v683_v8 = vld [vmem:[%s2421_s3 + $0x8] sm:$0xff] }
   0x3   :  { %404 = vmatpush.bf16.msra.mxu0 %v1709_v2  ;;  %493 = vmatpush.bf16.msra.mxu1 %v1717_v4  ;;  %v1716_v6 = vld [vmem:[%s2419_s1 + $0x70] sm:$0xff]  ;;  %v685_v7 = vld [vmem:[%s2421_s3 + $0x18] sm:$0xff]  ;;  %v1707_v9 = vld [vmem:[%s2419_s1 + $0x28] sm:$0xff] }
   0x4   :  { %1840 = vset.pattern.permute.xlu2 %v1869_v3  ;;  %v1715_v10 = vld [vmem:[%s2419_s1 + $0x68] sm:$0xff]  ;;  %v686_v11 = vld [vmem:[%s2421_s3 + $0x20] sm:$0xff] }
   0x5   :  { %v1706_v12 = vld [vmem:[%s2419_s1 + $0x20] sm:$0xff] }
   0x6   :  { %v1714_v13 = vld [vmem:[%s2419_s1 + $0x60] sm:$0xff] }
   0x7   :  { %405 = vmatpush.bf16.msra.mxu0 %v1708_v5  ;;  %494 = vmatpush.bf16.msra.mxu1 %v1716_v6 }
   0xa   :  { %731 = vperm.xlu1 %1839, %v685_v7   ;;  %721 = vperm.xlu0 %1838, %v683_v8  }
   0xb   :  { %406 = vmatpush.bf16.msra.mxu0 %v1707_v9  ;;  %495 = vmatpush.bf16.msra.mxu1 %v1715_v10 }
   0xc   :  { %13 = vsyncpa [#allocation4], 0  ;;  %736 = vperm.xlu2 %1840, %v686_v11   ;;  %v689_v14 = vld [vmem:[%s2421_s3 + $0x38] sm:$0xff]  ;;  %v688_v15 = vld [vmem:[%s2421_s3 + $0x30] sm:$0xff]  ;;  %vm35_vm0 = vcmask 261120   ;;  %s1514_s10 = sshll.u32 %s2426_s8, 4  ;;  %s1515_s10 = int_to_ptr.hbm [resolvable:$true] %s1514_s10 }
   0xd   :  { %v1705_v16 = vld [vmem:[%s2419_s1 + $0x18] sm:$0xff]  ;;  %v687_v18 = vld [vmem:[%s2421_s3 + $0x28] sm:$0xff]  ;;  %v1704_v19 = vld [vmem:[%s2419_s1 + $0x10] sm:$0xff]  ;;  %s1872_s11 = smov 64   ;;  %s1873_s12 = smov 4  }
   0xe   :  { %v1713_v17 = vld [vmem:[%s2419_s1 + $0x58] sm:$0xff]  ;;  %v1712_v20 = vld [vmem:[%s2419_s1 + $0x50] sm:$0xff]  ;;  %v68_v21 = vld [vmem:[%s2418_s0] sm:$0xff] }
   0xf   :  { %407 = vmatpush.bf16.msra.mxu0 %v1706_v12  ;;  %496 = vmatpush.bf16.msra.mxu1 %v1714_v13  ;;  %v69_v22 = vld [vmem:[%s2418_s0 + $0x8] sm:$0xff]  ;;  %v692_v23 = vld [vmem:[%s2421_s3 + $0x50] sm:$0xff]  ;;  %v84_v27 = vunpack.c.0.s8 %v68_v21  ;;  %v86_v28 = vunpack.c.1.s8 %v68_v21  ;;  %v690_v31 = vld [vmem:[%s2421_s3 + $0x40] sm:$0xff]  ;;  %v88_v45 = vunpack.c.2.s8 %v68_v21  ;;  %v90_v46 = vunpack.c.3.s8 %v68_v21 }
  0x10   :  { %v691_v24 = vld [vmem:[%s2421_s3 + $0x48] sm:$0xff]  ;;  %v85_v29 = vunpack.c.0.s8 %v69_v22  ;;  %v87_v30 = vunpack.c.1.s8 %v69_v22  ;;  %v1702_v32 = vld [vmem:[%s2419_s1] sm:$0xff]  ;;  %v693_v42 = vld [vmem:[%s2421_s3 + $0x58] sm:$0xff]  ;;  %v89_v47 = vunpack.c.2.s8 %v69_v22  ;;  %v91_v48 = vunpack.c.3.s8 %v69_v22 }
  0x11   :  { %v1703_v25 = vld [vmem:[%s2419_s1 + $0x8] sm:$0xff]  ;;  %v1710_v33 = vld [vmem:[%s2419_s1 + $0x40] sm:$0xff]  ;;  %v148_v34 = vcvt.s32.f32 %v84_v27  ;;  %v150_v35 = vcvt.s32.f32 %v86_v28  ;;  %v697_v44 = vld [vmem:[%s2421_s3 + $0x78] sm:$0xff]  ;;  %v152_v50 = vcvt.s32.f32 %v88_v45  ;;  %v154_v51 = vcvt.s32.f32 %v90_v46 }
  0x12   :  { %751 = vperm.xlu1 %1839, %v689_v14   ;;  %746 = vperm.xlu0 %1838, %v688_v15   ;;  %v1711_v26 = vld [vmem:[%s2419_s1 + $0x48] sm:$0xff]  ;;  %v149_v36 = vcvt.s32.f32 %v85_v29  ;;  %v151_v37 = vcvt.s32.f32 %v87_v30  ;;  %v694_v39 = vld [vmem:[%s2421_s3 + $0x60] sm:$0xff]  ;;  %v696_v49 = vld [vmem:[%s2421_s3 + $0x70] sm:$0xff]  ;;  %v153_v52 = vcvt.s32.f32 %v89_v47  ;;  %v155_v53 = vcvt.s32.f32 %v91_v48 }
  0x13   :  { %408 = vmatpush.bf16.msra.mxu0 %v1705_v16  ;;  %497 = vmatpush.bf16.msra.mxu1 %v1713_v17  ;;  %v695_v38 = vld [vmem:[%s2421_s3 + $0x68] sm:$0xff]  ;;  %v212_v40 = vpack.c.bf16 %v150_v35, %v148_v34  ;;  %v698_v43 = vld [vmem:[%s2421_s3 + $0x80] sm:$0xff]  ;;  %v701_v54 = vld [vmem:[%s2421_s3 + $0x98] sm:$0xff]  ;;  %v214_v56 = vpack.c.bf16 %v154_v51, %v152_v50 }
  0x14   :  { %741 = vperm.xlu2 %1840, %v687_v18   ;;  %v213_v41 = vpack.c.bf16 %v151_v37, %v149_v36  ;;  %v700_v55 = vld [vmem:[%s2421_s3 + $0x90] sm:$0xff]  ;;  %v215_v57 = vpack.c.bf16 %v155_v53, %v153_v52  ;;  %v699_v58 = vld [vmem:[%s2421_s3 + $0x88] sm:$0xff]  ;;  %v71_v60 = vld [vmem:[%s2418_s0 + $0x18] sm:$0xff] }
  0x15   :  { %v70_v59 = vld [vmem:[%s2418_s0 + $0x10] sm:$0xff]  ;;  %v703_v62 = vld [vmem:[%s2421_s3 + $0xa8] sm:$0xff]  ;;  %v93_v1 = vunpack.c.0.s8 %v71_v60  ;;  %v95_v2 = vunpack.c.1.s8 %v71_v60  ;;  %v702_v3 = vld [vmem:[%s2421_s3 + $0xa0] sm:$0xff]  ;;  %v97_v17 = vunpack.c.2.s8 %v71_v60  ;;  %v99_v18 = vunpack.c.3.s8 %v71_v60 }
  0x16   :  { %v704_v61 = vld [vmem:[%s2421_s3 + $0xb0] sm:$0xff]  ;;  %v92_v63 = vunpack.c.0.s8 %v70_v59  ;;  %v94_v0 = vunpack.c.1.s8 %v70_v59  ;;  %v707_v8 = vld [vmem:[%s2421_s3 + $0xc8] sm:$0xff]  ;;  %v706_v9 = vld [vmem:[%s2421_s3 + $0xc0] sm:$0xff]  ;;  %v96_v15 = vunpack.c.2.s8 %v70_v59  ;;  %v98_v16 = vunpack.c.3.s8 %v70_v59 }
  0x17   :  { %409 = vmatpush.bf16.msra.mxu0 %v1704_v19  ;;  %498 = vmatpush.bf16.msra.mxu1 %v1712_v20  ;;  %v157_v6 = vcvt.s32.f32 %v93_v1  ;;  %v159_v7 = vcvt.s32.f32 %v95_v2  ;;  %v705_v12 = vld [vmem:[%s2421_s3 + $0xb8] sm:$0xff]  ;;  %v710_v13 = vld [vmem:[%s2421_s3 + $0xe0] sm:$0xff]  ;;  %v708_v19 = vld [vmem:[%s2421_s3 + $0xd0] sm:$0xff]  ;;  %v161_v22 = vcvt.s32.f32 %v97_v17 }
  0x18   :  { %v156_v4 = vcvt.s32.f32 %v92_v63  ;;  %v158_v5 = vcvt.s32.f32 %v94_v0  ;;  %v709_v14 = vld [vmem:[%s2421_s3 + $0xd8] sm:$0xff]  ;;  %v160_v20 = vcvt.s32.f32 %v96_v15  ;;  %v162_v21 = vcvt.s32.f32 %v98_v16  ;;  %v711_v28 = vld [vmem:[%s2421_s3 + $0xe8] sm:$0xff]  ;;  %v72_v29 = vld [vmem:[%s2418_s0 + $0x20] sm:$0xff] }
  0x19   :  { %v217_v11 = vpack.c.bf16 %v159_v7, %v157_v6  ;;  %v73_v30 = vld [vmem:[%s2418_s0 + $0x28] sm:$0xff]  ;;  %v74_v51 = vld [vmem:[%s2418_s0 + $0x30] sm:$0xff]  ;;  %v75_v52 = vld [vmem:[%s2418_s0 + $0x38] sm:$0xff] }
  0x1a   :  { %766 = vperm.xlu1 %1839, %v692_v23   ;;  %761 = vperm.xlu0 %1838, %v691_v24   ;;  %v216_v10 = vpack.c.bf16 %v158_v5, %v156_v4  ;;  %v163_v23 = vcvt.s32.f32 %v99_v18  ;;  %v713_v24 = vld [vmem:[%s2421_s3 + $0xf8] sm:$0xff]  ;;  %v103_v34 = vunpack.c.1.s8 %v73_v30  ;;  %v108_v53 = vunpack.c.0.s8 %v74_v51  ;;  %v1737_v4 = vld [vmem:[%s2423_s5 + $0x8] sm:$0xff]  ;;  %v1718_v16 = vld [vmem:[%s2422_s4] sm:$0xff] }
  0x1b   :  { %410 = vmatpush.bf16.msra.mxu0 %v1703_v25  ;;  %499 = vmatpush.bf16.msra.mxu1 %v1711_v26  ;;  %v712_v25 = vld [vmem:[%s2421_s3 + $0xf0] sm:$0xff]  ;;  %v218_v26 = vpack.c.bf16 %v162_v21, %v160_v20  ;;  %v112_v0 = vunpack.c.2.s8 %v74_v51  ;;  %v114_v1 = vunpack.c.3.s8 %v74_v51  ;;  %v113_v2 = vunpack.c.2.s8 %v75_v52  ;;  %v77_v15 = vld [vmem:[%s2418_s0 + $0x48] sm:$0xff] }
  0x1c   :  { %756 = vperm.xlu2 %1840, %v690_v31   ;;  %v219_v27 = vpack.c.bf16 %v163_v23, %v161_v22  ;;  %v100_v31 = vunpack.c.0.s8 %v72_v29  ;;  %1108 = vmatpush.bf16.msra.mxu2 %v1737_v4  ;;  %v119_v20 = vunpack.c.1.s8 %v77_v15 }
  0x1d   :  { %v176_v5 = vcvt.s32.f32 %v112_v0  ;;  %v178_v6 = vcvt.s32.f32 %v114_v1  ;;  %v177_v7 = vcvt.s32.f32 %v113_v2 }
  0x1e   :  { %v164_v35 = vcvt.s32.f32 %v100_v31 }
  0x1f   :  { %411 = vmatpush.bf16.msra.mxu0 %v1702_v32  ;;  %500 = vmatpush.bf16.msra.mxu1 %v1710_v33  ;;  %v102_v32 = vunpack.c.1.s8 %v72_v29  ;;  %v101_v33 = vunpack.c.0.s8 %v73_v30 }
  0x21   :  { %v166_v36 = vcvt.s32.f32 %v102_v32  ;;  %v165_v37 = vcvt.s32.f32 %v101_v33 }
  0x22   :  { %781 = vperm.xlu1 %1839, %v695_v38   ;;  %776 = vperm.xlu0 %1838, %v694_v39   ;;  %v167_v38 = vcvt.s32.f32 %v103_v34 }
  0x23   :  { %412 = vmatmul.bf16.vlgmr.msra.gmra.mxu0 %v212_v40  ;;  %501 = vmatmul.bf16.vlgmr.msra.gmra.mxu1 %v213_v41  ;;  %v220_v39 = vpack.c.bf16 %v166_v36, %v164_v35  ;;  %v104_v41 = vunpack.c.2.s8 %v72_v29  ;;  %v121_v35 = vunpack.c.2.s8 %v77_v15  ;;  %v123_v36 = vunpack.c.3.s8 %v77_v15 }
  0x24   :  { %771 = vperm.xlu2 %1840, %v693_v42   ;;  %v221_v40 = vpack.c.bf16 %v167_v38, %v165_v37  ;;  %v106_v42 = vunpack.c.3.s8 %v72_v29 }
  0x25   :  { %v168_v45 = vcvt.s32.f32 %v104_v41 }
  0x26   :  { %v170_v46 = vcvt.s32.f32 %v106_v42 }
  0x2a   :  { %796 = vperm.xlu1 %1839, %v698_v43   ;;  %791 = vperm.xlu0 %1838, %v697_v44   ;;  %v105_v43 = vunpack.c.2.s8 %v73_v30  ;;  %v107_v44 = vunpack.c.3.s8 %v73_v30 }
  0x2c   :  { %786 = vperm.xlu2 %1840, %v696_v49   ;;  %v169_v47 = vcvt.s32.f32 %v105_v43  ;;  %v171_v48 = vcvt.s32.f32 %v107_v44  ;;  %v222_v49 = vpack.c.bf16 %v170_v46, %v168_v45  ;;  %v185_v45 = vcvt.s32.f32 %v121_v35 }
  0x2d   :  { %v187_v46 = vcvt.s32.f32 %v123_v36 }
  0x2e   :  { %v223_v50 = vpack.c.bf16 %v171_v48, %v169_v47 }
  0x2f   :  { %v231_v48 = vpack.c.bf16 %v187_v46, %v185_v45 }
  0x32   :  { %811 = vperm.xlu1 %1839, %v701_v54   ;;  %806 = vperm.xlu0 %1838, %v700_v55   ;;  %v110_v54 = vunpack.c.1.s8 %v74_v51  ;;  %v109_v55 = vunpack.c.0.s8 %v75_v52 }
  0x33   :  { %417 = vmatmul.bf16.gmra.mxu0 %v214_v56  ;;  %506 = vmatmul.bf16.gmra.mxu1 %v215_v57  ;;  %v111_v56 = vunpack.c.1.s8 %v75_v52  ;;  %v172_v57 = vcvt.s32.f32 %v108_v53 }
  0x34   :  { %801 = vperm.xlu2 %1840, %v699_v58   ;;  %v174_v58 = vcvt.s32.f32 %v110_v54  ;;  %v173_v59 = vcvt.s32.f32 %v109_v55 }
  0x35   :  { %v175_v60 = vcvt.s32.f32 %v111_v56  ;;  %v78_v56 = vld [vmem:[%s2418_s0 + $0x50] sm:$0xff] }
  0x36   :  { %v126_v0 = vunpack.c.1.s8 %v78_v56 }
  0x37   :  { %v225_v63 = vpack.c.bf16 %v175_v60, %v173_v59  ;;  %v79_v59 = vld [vmem:[%s2418_s0 + $0x58] sm:$0xff] }
  0x38   :  { %v125_v1 = vunpack.c.0.s8 %v79_v59  ;;  %v127_v2 = vunpack.c.1.s8 %v79_v59 }
  0x3a   :  { %826 = vperm.xlu1 %1839, %v704_v61   ;;  %821 = vperm.xlu0 %1838, %v703_v62   ;;  %v1870_v61 = vmov 0.0   ;;  %v224_v62 = vpack.c.bf16 %v174_v58, %v172_v57 }
  0x3b   :  { %36 = vst.msk [vmem:[#allocation2] sm:$0xff] %vm35_vm0, %v1870_v61 }
  0x3c   :  { %816 = vperm.xlu2 %1840, %v702_v3   ;;  %37 = vst.msk [vmem:[#allocation2 + $0x8] sm:$0xff] %vm35_vm0, %v1870_v61  ;;  %v115_v3 = vunpack.c.3.s8 %v75_v52 }
  0x3d   :  { %38 = vst.msk [vmem:[#allocation2 + $0x10] sm:$0xff] %vm35_vm0, %v1870_v61 }
  0x3e   :  { %39 = vst.msk [vmem:[#allocation2 + $0x18] sm:$0xff] %vm35_vm0, %v1870_v61 }
  0x3f   :  { %40 = vst.msk [vmem:[#allocation2 + $0x20] sm:$0xff] %vm35_vm0, %v1870_v61 }
  0x40   :  { %41 = vst.msk [vmem:[#allocation2 + $0x28] sm:$0xff] %vm35_vm0, %v1870_v61 }
  0x41   :  { %42 = vst.msk [vmem:[#allocation2 + $0x30] sm:$0xff] %vm35_vm0, %v1870_v61 }
  0x42   :  { %841 = vperm.xlu1 %1839, %v707_v8   ;;  %836 = vperm.xlu0 %1838, %v706_v9   ;;  %43 = vst.msk [vmem:[#allocation2 + $0x38] sm:$0xff] %vm35_vm0, %v1870_v61  ;;  %v179_v8 = vcvt.s32.f32 %v115_v3  ;;  %v1736_v9 = vld [vmem:[%s2423_s5] sm:$0xff] }
  0x43   :  { %422 = vmatmul.bf16.gmra.mxu0 %v216_v10  ;;  %511 = vmatmul.bf16.gmra.mxu1 %v217_v11  ;;  %44 = vst.msk [vmem:[#allocation2 + $0x40] sm:$0xff] %vm35_vm0, %v1870_v61  ;;  %v226_v10 = vpack.c.bf16 %v178_v6, %v176_v5  ;;  %v244_v29 = vld [vmem:[#allocation2] sm:$0xff]  ;;  %v245_v38 = vld [vmem:[#allocation2 + $0x8] sm:$0xff] }
  0x44   :  { %831 = vperm.xlu2 %1840, %v705_v12   ;;  %45 = vst.msk [vmem:[#allocation2 + $0x48] sm:$0xff] %vm35_vm0, %v1870_v61  ;;  %1109 = vmatpush.bf16.msra.mxu2 %v1736_v9  ;;  %v227_v11 = vpack.c.bf16 %v179_v8, %v177_v7  ;;  %v1720_v12 = vld [vmem:[%s2420_s2] sm:$0xff]  ;;  %v246_v51 = vld [vmem:[#allocation2 + $0x10] sm:$0xff] }
  0x45   :  { %46 = vst.msk [vmem:[#allocation2 + $0x50] sm:$0xff] %vm35_vm0, %v1870_v61  ;;  %v247_v4 = vld [vmem:[#allocation2 + $0x18] sm:$0xff] }
  0x46   :  { %47 = vst.msk [vmem:[#allocation2 + $0x58] sm:$0xff] %vm35_vm0, %v1870_v61 }
  0x47   :  { %48 = vst.msk [vmem:[#allocation2 + $0x60] sm:$0xff] %vm35_vm0, %v1870_v61  ;;  %1662 = vmatmul.msk.bf16.vlgmr.msra.gmra.mxu2 %vm35_vm0, %v1720_v12  ;;  %v191_v12 = vcvt.s32.f32 %v127_v2 }
  0x48   :  { %49 = vst.msk [vmem:[#allocation2 + $0x68] sm:$0xff] %vm35_vm0, %v1870_v61  ;;  %v250_v45 = vld [vmem:[#allocation2 + $0x30] sm:$0xff] }
  0x49   :  { %50 = vst.msk [vmem:[#allocation2 + $0x70] sm:$0xff] %vm35_vm0, %v1870_v61 }
  0x4a   :  { %856 = vperm.xlu1 %1839, %v710_v13   ;;  %851 = vperm.xlu0 %1838, %v709_v14   ;;  %51 = vst.msk [vmem:[#allocation2 + $0x78] sm:$0xff] %vm35_vm0, %v1870_v61  ;;  %v1719_v13 = vld [vmem:[%s2422_s4 + $0x8] sm:$0xff]  ;;  %v76_v14 = vld [vmem:[%s2418_s0 + $0x40] sm:$0xff] }
  0x4b   :  { %52 = vst.msk [vmem:[#allocation2 + $0x80] sm:$0xff] %vm35_vm0, %v1870_v61  ;;  %1257 = vmatpush.bf16.msra.mxu3 %v1719_v13  ;;  %v116_v17 = vunpack.c.0.s8 %v76_v14  ;;  %v118_v18 = vunpack.c.1.s8 %v76_v14  ;;  %v120_v33 = vunpack.c.2.s8 %v76_v14  ;;  %v122_v34 = vunpack.c.3.s8 %v76_v14 }
  0x4c   :  { %846 = vperm.xlu2 %1840, %v708_v19   ;;  %53 = vst.msk [vmem:[#allocation2 + $0x88] sm:$0xff] %vm35_vm0, %v1870_v61  ;;  %v117_v19 = vunpack.c.0.s8 %v77_v15  ;;  %v1723_v15 = vld [vmem:[%s2420_s2 + $0x18] sm:$0xff] }
  0x4d   :  { %54 = vst.msk [vmem:[#allocation2 + $0x90] sm:$0xff] %vm35_vm0, %v1870_v61  ;;  %v180_v21 = vcvt.s32.f32 %v116_v17  ;;  %v182_v22 = vcvt.s32.f32 %v118_v18  ;;  %v184_v42 = vcvt.s32.f32 %v120_v33  ;;  %v186_v44 = vcvt.s32.f32 %v122_v34  ;;  %v248_v17 = vld [vmem:[#allocation2 + $0x20] sm:$0xff] }
  0x4e   :  { %55 = vst.msk [vmem:[#allocation2 + $0x98] sm:$0xff] %vm35_vm0, %v1870_v61  ;;  %v181_v23 = vcvt.s32.f32 %v117_v19 }
  0x4f   :  { %56 = vst.msk [vmem:[#allocation2 + $0xa0] sm:$0xff] %vm35_vm0, %v1870_v61  ;;  %1258 = vmatpush.bf16.msra.mxu3 %v1718_v16  ;;  %v230_v47 = vpack.c.bf16 %v186_v44, %v184_v42 }
  0x50   :  { %57 = vst.msk [vmem:[#allocation2 + $0xa8] sm:$0xff] %vm35_vm0, %v1870_v61 }
  0x51   :  { %58 = vst.msk [vmem:[#allocation2 + $0xb0] sm:$0xff] %vm35_vm0, %v1870_v61 }
  0x52   :  { %871 = vperm.xlu1 %1839, %v713_v24   ;;  %866 = vperm.xlu0 %1838, %v712_v25   ;;  %59 = vst.msk [vmem:[#allocation2 + $0xb8] sm:$0xff] %vm35_vm0, %v1870_v61  ;;  %v183_v24 = vcvt.s32.f32 %v119_v20  ;;  %v228_v25 = vpack.c.bf16 %v182_v22, %v180_v21 }
  0x53   :  { %427 = vmatmul.bf16.gmra.mxu0 %v218_v26  ;;  %516 = vmatmul.bf16.gmra.mxu1 %v219_v27  ;;  %60 = vst.msk [vmem:[#allocation2 + $0xc0] sm:$0xff] %vm35_vm0, %v1870_v61  ;;  %v1721_v27 = vld [vmem:[%s2420_s2 + $0x8] sm:$0xff] }
  0x54   :  { %861 = vperm.xlu2 %1840, %v711_v28   ;;  %61 = vst.msk [vmem:[#allocation2 + $0xc8] sm:$0xff] %vm35_vm0, %v1870_v61  ;;  %v229_v26 = vpack.c.bf16 %v183_v24, %v181_v23 }
  0x55   :  { %62 = vst.msk [vmem:[#allocation2 + $0xd0] sm:$0xff] %vm35_vm0, %v1870_v61 }
  0x56   :  { %63 = vst.msk [vmem:[#allocation2 + $0xd8] sm:$0xff] %vm35_vm0, %v1870_v61 }
  0x57   :  { %64 = vst.msk [vmem:[#allocation2 + $0xe0] sm:$0xff] %vm35_vm0, %v1870_v61  ;;  %1663 = vmatmul.msk.bf16.gmra.mxu2 %vm35_vm0, %v1721_v27 }
  0x58   :  { %65 = vst.msk [vmem:[#allocation2 + $0xe8] sm:$0xff] %vm35_vm0, %v1870_v61 }
  0x59   :  { %66 = vst.msk [vmem:[#allocation2 + $0xf0] sm:$0xff] %vm35_vm0, %v1870_v61 }
  0x5a   :  { %67 = vst.msk [vmem:[#allocation2 + $0xf8] sm:$0xff] %vm35_vm0, %v1870_v61 }
  0x63   :  { %432 = vmatmul.bf16.gmra.mxu0 %v220_v39  ;;  %521 = vmatmul.bf16.gmra.mxu1 %v221_v40 }
  0x66   :  { %v737_v35 = vpop.permute.xlu2 %736 }
  0x73   :  { %437 = vmatmul.bf16.gmra.mxu0 %v222_v49  ;;  %526 = vmatmul.bf16.gmra.mxu1 %v223_v50  ;;  %v1722_v49 = vld [vmem:[%s2420_s2 + $0x10] sm:$0xff] }
  0x74   :  { %v717_v41 = vpop.permute.xlu0 %716  ;;  %1664 = vmatmul.msk.bf16.gmra.mxu2 %vm35_vm0, %v1722_v49  ;;  %v727_v7 = vpop.permute.xlu1 %726 }
  0x7c   :  { %v722_v57 = vpop.permute.xlu0 %721  ;;  %v732_v22 = vpop.permute.xlu1 %731 }
  0x83   :  { %442 = vmatmul.bf16.gmra.mxu0 %v224_v62  ;;  %531 = vmatmul.bf16.gmra.mxu1 %v225_v63  ;;  %v124_v62 = vunpack.c.0.s8 %v78_v56 }
  0x84   :  { %1665 = vmatmul.msk.bf16.gmra.mxu2 %vm35_vm0, %v1723_v15  ;;  %v752_v15 = vpop.permute.xlu1 %751 }
  0x85   :  { %v188_v8 = vcvt.s32.f32 %v124_v62  ;;  %v251_v62 = vld [vmem:[#allocation2 + $0x38] sm:$0xff] }
  0x93   :  { %447 = vmatmul.bf16.gmra.mxu0 %v226_v10  ;;  %536 = vmatmul.bf16.gmra.mxu1 %v227_v11  ;;  %v190_v10 = vcvt.s32.f32 %v126_v0  ;;  %v189_v11 = vcvt.s32.f32 %v125_v1 }
  0x95   :  { %v232_v13 = vpack.c.bf16 %v190_v10, %v188_v8  ;;  %v233_v14 = vpack.c.bf16 %v191_v12, %v189_v11  ;;  %v1725_v8 = vld [vmem:[%s2420_s2 + $0x28] sm:$0xff]  ;;  %v252_v10 = vld [vmem:[#allocation2 + $0x40] sm:$0xff] }
  0xa0   :  { %v413_v28 = vpop.f32.mrf.mxu0  ;;  %v502_v30 = vpop.f32.mrf.mxu1 }
  0xa1   :  { %v503_v31 = vadd.f32 %v502_v30, %v413_v28  ;;  %v130_v28 = vunpack.c.3.s8 %v78_v56  ;;  %v131_v30 = vunpack.c.3.s8 %v79_v59 }
  0xa3   :  { %v582_v32 = vadd.f32 %v503_v31, %v244_v29  ;;  %452 = vmatmul.bf16.gmra.mxu0 %v228_v25  ;;  %541 = vmatmul.bf16.gmra.mxu1 %v229_v26  ;;  %v128_v26 = vunpack.c.2.s8 %v78_v56  ;;  %v129_v29 = vunpack.c.2.s8 %v79_v59 }
  0xa5   :  { %615 = vst.msk [vmem:[#allocation2] sm:$0xff] %vm35_vm0, %v582_v32  ;;  %v249_v32 = vld [vmem:[#allocation2 + $0x28] sm:$0xff]  ;;  %v192_v36 = vcvt.s32.f32 %v128_v26 }
  0xa6   :  { %v253_v26 = vld [vmem:[#allocation2 + $0x48] sm:$0xff] }
  0xa8   :  { %v415_v37 = vpop.f32.mrf.mxu0  ;;  %v504_v39 = vpop.f32.mrf.mxu1 }
  0xa9   :  { %v505_v40 = vadd.f32 %v504_v39, %v415_v37  ;;  %v193_v39 = vcvt.s32.f32 %v129_v29 }
  0xab   :  { %v583_v43 = vadd.f32 %v505_v40, %v245_v38  ;;  %v194_v38 = vcvt.s32.f32 %v130_v28  ;;  %v195_v40 = vcvt.s32.f32 %v131_v30 }
  0xac   :  { %v650_v54 = vld [vmem:[#allocation2] sm:$0xff] }
  0xad   :  { %616 = vst.msk [vmem:[#allocation2 + $0x8] sm:$0xff] %vm35_vm0, %v583_v43  ;;  %v874_v60 = vmul.f32 %v717_v41, %v650_v54  ;;  %v234_v41 = vpack.c.bf16 %v194_v38, %v192_v36  ;;  %v235_v42 = vpack.c.bf16 %v195_v40, %v193_v39  ;;  %v1724_v43 = vld [vmem:[%s2420_s2 + $0x20] sm:$0xff]  ;;  %v1726_v36 = vld [vmem:[%s2420_s2 + $0x30] sm:$0xff] }
  0xae   :  { %1666 = vmatmul.msk.bf16.gmra.mxu2 %vm35_vm0, %v1724_v43  ;;  %v254_v38 = vld [vmem:[#allocation2 + $0x50] sm:$0xff] }
  0xaf   :  { %v82_v43 = vld [vmem:[%s2418_s0 + $0x70] sm:$0xff] }
  0xb0   :  { %v418_v50 = vpop.f32.mrf.mxu0  ;;  %v507_v52 = vpop.f32.mrf.mxu1 }
  0xb1   :  { %v508_v53 = vadd.f32 %v507_v52, %v418_v50  ;;  %v80_v50 = vld [vmem:[%s2418_s0 + $0x60] sm:$0xff] }
  0xb2   :  { %v132_v56 = vunpack.c.0.s8 %v80_v50 }
  0xb3   :  { %v584_v55 = vadd.f32 %v508_v53, %v246_v51  ;;  %457 = vmatmul.bf16.gmra.mxu0 %v230_v47  ;;  %546 = vmatmul.bf16.gmra.mxu1 %v231_v48  ;;  %v742_v51 = vpop.permute.xlu2 %741  ;;  %v81_v53 = vld [vmem:[%s2418_s0 + $0x68] sm:$0xff] }
  0xb4   :  { %v651_v58 = vld [vmem:[#allocation2 + $0x8] sm:$0xff]  ;;  %v133_v59 = vunpack.c.0.s8 %v81_v53  ;;  %v196_v1 = vcvt.s32.f32 %v132_v56  ;;  %v255_v56 = vld [vmem:[#allocation2 + $0x58] sm:$0xff] }
  0xb5   :  { %617 = vst.msk [vmem:[#allocation2 + $0x10] sm:$0xff] %vm35_vm0, %v584_v55  ;;  %v875_v61 = vmul.f32 %v722_v57, %v651_v58  ;;  %v134_v58 = vunpack.c.1.s8 %v80_v50 }
  0xb7   :  { %v906_v63 = vpack.c.bf16 %v875_v61, %v874_v60  ;;  %v135_v60 = vunpack.c.1.s8 %v81_v53 }
  0xb8   :  { %v420_v3 = vpop.f32.mrf.mxu0  ;;  %v509_v5 = vpop.f32.mrf.mxu1 }
  0xb9   :  { %v510_v6 = vadd.f32 %v509_v5, %v420_v3  ;;  %1686 = vmatmul.msk.bf16.vlgmr.msra.gmra.mxu3 %vm35_vm0, %v906_v63  ;;  %v198_v3 = vcvt.s32.f32 %v134_v58  ;;  %v199_v5 = vcvt.s32.f32 %v135_v60 }
  0xbb   :  { %v585_v9 = vadd.f32 %v510_v6, %v247_v4  ;;  %v197_v4 = vcvt.s32.f32 %v133_v59  ;;  %v236_v6 = vpack.c.bf16 %v198_v3, %v196_v1 }
  0xbc   :  { %v652_v20 = vld [vmem:[#allocation2 + $0x10] sm:$0xff] }
  0xbd   :  { %618 = vst.msk [vmem:[#allocation2 + $0x18] sm:$0xff] %vm35_vm0, %v585_v9  ;;  %v876_v24 = vmul.f32 %v727_v7, %v652_v20  ;;  %v237_v7 = vpack.c.bf16 %v199_v5, %v197_v4  ;;  %v136_v20 = vunpack.c.2.s8 %v80_v50  ;;  %v256_v4 = vld [vmem:[#allocation2 + $0x60] sm:$0xff] }
  0xbe   :  { %1667 = vmatmul.msk.bf16.gmra.mxu2 %vm35_vm0, %v1725_v8 }
  0xbf   :  { %v200_v29 = vcvt.s32.f32 %v136_v20  ;;  %v257_v20 = vld [vmem:[#allocation2 + $0x68] sm:$0xff] }
  0xc0   :  { %v423_v16 = vpop.f32.mrf.mxu0  ;;  %v512_v18 = vpop.f32.mrf.mxu1 }
  0xc1   :  { %v513_v19 = vadd.f32 %v512_v18, %v423_v16  ;;  %v747_v16 = vpop.permute.xlu0 %746 }
  0xc3   :  { %v586_v21 = vadd.f32 %v513_v19, %v248_v17  ;;  %462 = vmatmul.bf16.gmra.mxu0 %v232_v13  ;;  %551 = vmatmul.bf16.gmra.mxu1 %v233_v14 }
  0xc4   :  { %v653_v23 = vld [vmem:[#allocation2 + $0x18] sm:$0xff] }
  0xc5   :  { %619 = vst.msk [vmem:[#allocation2 + $0x20] sm:$0xff] %vm35_vm0, %v586_v21  ;;  %v877_v25 = vmul.f32 %v732_v22, %v653_v23  ;;  %v138_v22 = vunpack.c.3.s8 %v80_v50  ;;  %v137_v23 = vunpack.c.2.s8 %v81_v53  ;;  %v140_v50 = vunpack.c.0.s8 %v82_v43 }
  0xc7   :  { %v907_v27 = vpack.c.bf16 %v877_v25, %v876_v24  ;;  %v139_v24 = vunpack.c.3.s8 %v81_v53  ;;  %v204_v59 = vcvt.s32.f32 %v140_v50  ;;  %v1729_v50 = vld [vmem:[%s2420_s2 + $0x48] sm:$0xff] }
  0xc8   :  { %v425_v31 = vpop.f32.mrf.mxu0  ;;  %v514_v33 = vpop.f32.mrf.mxu1 }
  0xc9   :  { %v515_v34 = vadd.f32 %v514_v33, %v425_v31  ;;  %1687 = vmatmul.msk.bf16.gmra.mxu3 %vm35_vm0, %v907_v27  ;;  %v202_v31 = vcvt.s32.f32 %v138_v22  ;;  %v203_v33 = vcvt.s32.f32 %v139_v24 }
  0xcb   :  { %v587_v37 = vadd.f32 %v515_v34, %v249_v32  ;;  %v201_v32 = vcvt.s32.f32 %v137_v23  ;;  %v238_v34 = vpack.c.bf16 %v202_v31, %v200_v29 }
  0xcc   :  { %v654_v48 = vld [vmem:[#allocation2 + $0x20] sm:$0xff] }
  0xcd   :  { %620 = vst.msk [vmem:[#allocation2 + $0x28] sm:$0xff] %vm35_vm0, %v587_v37  ;;  %v878_v54 = vmul.f32 %v737_v35, %v654_v48  ;;  %v239_v35 = vpack.c.bf16 %v203_v33, %v201_v32  ;;  %v258_v32 = vld [vmem:[#allocation2 + $0x70] sm:$0xff] }
  0xce   :  { %1668 = vmatmul.msk.bf16.gmra.mxu2 %vm35_vm0, %v1726_v36 }
  0xd0   :  { %v428_v44 = vpop.f32.mrf.mxu0  ;;  %v517_v46 = vpop.f32.mrf.mxu1 }
  0xd1   :  { %v518_v47 = vadd.f32 %v517_v46, %v428_v44  ;;  %v762_v44 = vpop.permute.xlu0 %761 }
  0xd3   :  { %v588_v49 = vadd.f32 %v518_v47, %v250_v45  ;;  %467 = vmatmul.bf16.gmra.mxu0 %v234_v41  ;;  %556 = vmatmul.bf16.gmra.mxu1 %v235_v42  ;;  %v757_v45 = vpop.permute.xlu2 %756  ;;  %v83_v47 = vld [vmem:[%s2418_s0 + $0x78] sm:$0xff] }
  0xd4   :  { %v655_v52 = vld [vmem:[#allocation2 + $0x28] sm:$0xff]  ;;  %v141_v53 = vunpack.c.0.s8 %v83_v47 }
  0xd5   :  { %621 = vst.msk [vmem:[#allocation2 + $0x30] sm:$0xff] %vm35_vm0, %v588_v49  ;;  %v879_v55 = vmul.f32 %v742_v51, %v655_v52  ;;  %v142_v52 = vunpack.c.1.s8 %v82_v43 }
  0xd7   :  { %v908_v57 = vpack.c.bf16 %v879_v55, %v878_v54  ;;  %v143_v54 = vunpack.c.1.s8 %v83_v47 }
  0xd8   :  { %v430_v61 = vpop.f32.mrf.mxu0  ;;  %v519_v63 = vpop.f32.mrf.mxu1 }
  0xd9   :  { %v520_v0 = vadd.f32 %v519_v63, %v430_v61  ;;  %1688 = vmatmul.msk.bf16.gmra.mxu3 %vm35_vm0, %v908_v57  ;;  %v206_v61 = vcvt.s32.f32 %v142_v52  ;;  %v207_v63 = vcvt.s32.f32 %v143_v54  ;;  %v260_v52 = vld [vmem:[#allocation2 + $0x80] sm:$0xff] }
  0xdb   :  { %v589_v2 = vadd.f32 %v520_v0, %v251_v62  ;;  %v205_v62 = vcvt.s32.f32 %v141_v53  ;;  %v240_v0 = vpack.c.bf16 %v206_v61, %v204_v59 }
  0xdc   :  { %v656_v13 = vld [vmem:[#allocation2 + $0x30] sm:$0xff] }
  0xdd   :  { %622 = vst.msk [vmem:[#allocation2 + $0x38] sm:$0xff] %vm35_vm0, %v589_v2  ;;  %v880_v18 = vmul.f32 %v747_v16, %v656_v13  ;;  %v241_v1 = vpack.c.bf16 %v207_v63, %v205_v62  ;;  %v1727_v2 = vld [vmem:[%s2420_s2 + $0x38] sm:$0xff]  ;;  %v146_v16 = vunpack.c.3.s8 %v82_v43 }
  0xde   :  { %1669 = vmatmul.msk.bf16.gmra.mxu2 %vm35_vm0, %v1727_v2 }
  0xe0   :  { %v433_v9 = vpop.f32.mrf.mxu0  ;;  %v522_v11 = vpop.f32.mrf.mxu1 }
  0xe1   :  { %v523_v12 = vadd.f32 %v522_v11, %v433_v9  ;;  %v767_v9 = vpop.permute.xlu1 %766 }
  0xe3   :  { %v590_v14 = vadd.f32 %v523_v12, %v252_v10  ;;  %472 = vmatmul.bf16.gmra.mxu0 %v236_v6  ;;  %561 = vmatmul.bf16.gmra.mxu1 %v237_v7  ;;  %v772_v10 = vpop.permute.xlu2 %771 }
  0xe4   :  { %v657_v17 = vld [vmem:[#allocation2 + $0x38] sm:$0xff] }
  0xe5   :  { %623 = vst.msk [vmem:[#allocation2 + $0x40] sm:$0xff] %vm35_vm0, %v590_v14  ;;  %v881_v19 = vmul.f32 %v752_v15, %v657_v17  ;;  %v144_v14 = vunpack.c.2.s8 %v82_v43  ;;  %v145_v17 = vunpack.c.2.s8 %v83_v47 }
  0xe7   :  { %v909_v21 = vpack.c.bf16 %v881_v19, %v880_v18  ;;  %v147_v18 = vunpack.c.3.s8 %v83_v47  ;;  %v208_v23 = vcvt.s32.f32 %v144_v14 }
  0xe8   :  { %v435_v25 = vpop.f32.mrf.mxu0  ;;  %v524_v27 = vpop.f32.mrf.mxu1 }
  0xe9   :  { %v525_v28 = vadd.f32 %v524_v27, %v435_v25  ;;  %1689 = vmatmul.msk.bf16.gmra.mxu3 %vm35_vm0, %v909_v21  ;;  %v210_v25 = vcvt.s32.f32 %v146_v16  ;;  %v211_v27 = vcvt.s32.f32 %v147_v18  ;;  %v782_v36 = vpop.permute.xlu1 %781 }
  0xeb   :  { %v591_v30 = vadd.f32 %v525_v28, %v253_v26  ;;  %v209_v26 = vcvt.s32.f32 %v145_v17  ;;  %v242_v28 = vpack.c.bf16 %v210_v25, %v208_v23 }
  0xec   :  { %v658_v41 = vld [vmem:[#allocation2 + $0x40] sm:$0xff] }
  0xed   :  { %624 = vst.msk [vmem:[#allocation2 + $0x48] sm:$0xff] %vm35_vm0, %v591_v30  ;;  %v882_v48 = vmul.f32 %v757_v45, %v658_v41  ;;  %v243_v29 = vpack.c.bf16 %v211_v27, %v209_v26  ;;  %v1728_v30 = vld [vmem:[%s2420_s2 + $0x40] sm:$0xff]  ;;  %v259_v45 = vld [vmem:[#allocation2 + $0x78] sm:$0xff] }
  0xee   :  { %1670 = vmatmul.msk.bf16.gmra.mxu2 %vm35_vm0, %v1728_v30 }
  0xf0   :  { %v438_v37 = vpop.f32.mrf.mxu0  ;;  %v527_v39 = vpop.f32.mrf.mxu1 }
  0xf1   :  { %v528_v40 = vadd.f32 %v527_v39, %v438_v37  ;;  %v797_v14 = vpop.permute.xlu1 %796 }
  0xf3   :  { %v592_v42 = vadd.f32 %v528_v40, %v254_v38  ;;  %477 = vmatmul.bf16.gmra.mxu0 %v238_v34  ;;  %566 = vmatmul.bf16.gmra.mxu1 %v239_v35  ;;  %v777_v38 = vpop.permute.xlu0 %776  ;;  %v1111_v40 = vpop.f32.mrf.mxu2 }
  0xf4   :  { %v659_v46 = vld [vmem:[#allocation2 + $0x48] sm:$0xff] }
  0xf5   :  { %625 = vst.msk [vmem:[#allocation2 + $0x50] sm:$0xff] %vm35_vm0, %v592_v42  ;;  %v883_v49 = vmul.f32 %v762_v44, %v659_v46 }
  0xf7   :  { %v910_v51 = vpack.c.bf16 %v883_v49, %v882_v48 }
  0xf8   :  { %v440_v55 = vpop.f32.mrf.mxu0  ;;  %v529_v57 = vpop.f32.mrf.mxu1 }
  0xf9   :  { %v530_v58 = vadd.f32 %v529_v57, %v440_v55  ;;  %1690 = vmatmul.msk.bf16.gmra.mxu3 %vm35_vm0, %v910_v51 }
  0xfb   :  { %v593_v60 = vadd.f32 %v530_v58, %v255_v56  ;;  %v2245_v49 = vpop.f32.mrf.mxu2  ;;  %v787_v56 = vpop.permute.xlu2 %786 }
  0xfc   :  { %v660_v7 = vld [vmem:[#allocation2 + $0x50] sm:$0xff]  ;;  %v792_v58 = vpop.permute.xlu0 %791 }
  0xfd   :  { %626 = vst.msk [vmem:[#allocation2 + $0x58] sm:$0xff] %vm35_vm0, %v593_v60  ;;  %v884_v12 = vmul.f32 %v767_v9, %v660_v7 }
  0xfe   :  { %1671 = vmatmul.msk.bf16.gmra.mxu2 %vm35_vm0, %v1729_v50 }
 0x100   :  { %v443_v3 = vpop.f32.mrf.mxu0  ;;  %v532_v5 = vpop.f32.mrf.mxu1 }
 0x101   :  { %v533_v6 = vadd.f32 %v532_v5, %v443_v3 }
 0x103   :  { %v594_v8 = vadd.f32 %v533_v6, %v256_v4  ;;  %482 = vmatmul.bf16.gmra.mxu0 %v240_v0  ;;  %571 = vmatmul.bf16.gmra.mxu1 %v241_v1  ;;  %v2252_v60 = vpop.f32.mrf.mxu2  ;;  %v261_v1 = vld [vmem:[#allocation2 + $0x88] sm:$0xff]  ;;  %v1730_v6 = vld [vmem:[%s2420_s2 + $0x50] sm:$0xff] }
 0x104   :  { %v661_v11 = vld [vmem:[#allocation2 + $0x58] sm:$0xff] }
 0x105   :  { %627 = vst.msk [vmem:[#allocation2 + $0x60] sm:$0xff] %vm35_vm0, %v594_v8  ;;  %v885_v13 = vmul.f32 %v772_v10, %v661_v11  ;;  %v262_v8 = vld [vmem:[#allocation2 + $0x90] sm:$0xff] }
 0x107   :  { %v911_v15 = vpack.c.bf16 %v885_v13, %v884_v12  ;;  %v802_v12 = vpop.permute.xlu2 %801 }
 0x108   :  { %v445_v19 = vpop.f32.mrf.mxu0  ;;  %v534_v21 = vpop.f32.mrf.mxu1 }
 0x109   :  { %v535_v22 = vadd.f32 %v534_v21, %v445_v19  ;;  %1691 = vmatmul.msk.bf16.gmra.mxu3 %vm35_vm0, %v911_v15  ;;  %v263_v21 = vld [vmem:[#allocation2 + $0x98] sm:$0xff] }
 0x10b   :  { %v595_v24 = vadd.f32 %v535_v22, %v257_v20  ;;  %v2256_v5 = vpop.f32.mrf.mxu2 }
 0x10c   :  { %v662_v35 = vld [vmem:[#allocation2 + $0x60] sm:$0xff] }
 0x10d   :  { %628 = vst.msk [vmem:[#allocation2 + $0x68] sm:$0xff] %vm35_vm0, %v595_v24  ;;  %v886_v41 = vmul.f32 %v777_v38, %v662_v35  ;;  %v812_v35 = vpop.permute.xlu1 %811  ;;  %v2283_v38 = vld [vmem:[%s2425_s7] ss:$0 sm:$0xff] }
 0x10e   :  { %1672 = vmatmul.msk.bf16.gmra.mxu2 %vm35_vm0, %v1730_v6 }
 0x10f   :  { %v817_v6 = vpop.permute.xlu2 %816 }
 0x110   :  { %v448_v31 = vpop.f32.mrf.mxu0  ;;  %v537_v33 = vpop.f32.mrf.mxu1 }
 0x111   :  { %v538_v34 = vadd.f32 %v537_v33, %v448_v31  ;;  %v264_v31 = vld [vmem:[#allocation2 + $0xa0] sm:$0xff] }
 0x113   :  { %v596_v37 = vadd.f32 %v538_v34, %v258_v32  ;;  %487 = vmatmul.bf16.gmra.mxu0 %v242_v28  ;;  %576 = vmatmul.bf16.gmra.mxu1 %v243_v29  ;;  %v2263_v16 = vpop.f32.mrf.mxu2  ;;  %v2273_v28 = vld [vmem:[%s2424_s6] ss:$0 sm:$0xff]  ;;  %v1731_v29 = vld [vmem:[%s2420_s2 + $0x58] sm:$0xff] }
 0x114   :  { %v663_v39 = vld [vmem:[#allocation2 + $0x68] sm:$0xff] }
 0x115   :  { %629 = vst.msk [vmem:[#allocation2 + $0x70] sm:$0xff] %vm35_vm0, %v596_v37  ;;  %v887_v42 = vmul.f32 %v782_v36, %v663_v39  ;;  %v807_v36 = vpop.permute.xlu0 %806 }
 0x117   :  { %v912_v43 = vpack.c.bf16 %v887_v42, %v886_v41 }
 0x118   :  { %v450_v44 = vpop.f32.mrf.mxu0  ;;  %v539_v46 = vpop.f32.mrf.mxu1 }
 0x119   :  { %v540_v47 = vadd.f32 %v539_v46, %v450_v44  ;;  %1692 = vmatmul.msk.bf16.gmra.mxu3 %vm35_vm0, %v912_v43 }
 0x11b   :  { %v597_v48 = vadd.f32 %v540_v47, %v259_v45  ;;  %v2267_v26 = vpop.f32.mrf.mxu2 }
 0x11c   :  { %v664_v55 = vld [vmem:[#allocation2 + $0x70] sm:$0xff] }
 0x11d   :  { %630 = vst.msk [vmem:[#allocation2 + $0x78] sm:$0xff] %vm35_vm0, %v597_v48  ;;  %v888_v61 = vmul.f32 %v787_v56, %v664_v55 }
 0x11e   :  { %1673 = vmatmul.msk.bf16.gmra.mxu2 %vm35_vm0, %v1731_v29 }
 0x120   :  { %v453_v51 = vpop.f32.mrf.mxu0  ;;  %v542_v53 = vpop.f32.mrf.mxu1 }
 0x121   :  { %v543_v54 = vadd.f32 %v542_v53, %v453_v51  ;;  %v265_v51 = vld [vmem:[#allocation2 + $0xa8] sm:$0xff] }
 0x123   :  { %v598_v57 = vadd.f32 %v543_v54, %v260_v52  ;;  %v2285_v42 = vpop.f32.mrf.mxu2 }
 0x124   :  { %v665_v59 = vld [vmem:[#allocation2 + $0x78] sm:$0xff] }
 0x125   :  { %631 = vst.msk [vmem:[#allocation2 + $0x80] sm:$0xff] %vm35_vm0, %v598_v57  ;;  %v889_v62 = vmul.f32 %v792_v58, %v665_v59 }
 0x127   :  { %v913_v63 = vpack.c.bf16 %v889_v62, %v888_v61  ;;  %v1732_v62 = vld [vmem:[%s2420_s2 + $0x60] sm:$0xff] }
 0x128   :  { %v455_v0 = vpop.f32.mrf.mxu0  ;;  %v544_v2 = vpop.f32.mrf.mxu1 }
 0x129   :  { %v545_v3 = vadd.f32 %v544_v2, %v455_v0  ;;  %1693 = vmatmul.msk.bf16.gmra.mxu3 %vm35_vm0, %v913_v63  ;;  %v266_v0 = vld [vmem:[#allocation2 + $0xb0] sm:$0xff] }
 0x12b   :  { %v599_v4 = vadd.f32 %v545_v3, %v261_v1 }
 0x12c   :  { %v666_v11 = vld [vmem:[#allocation2 + $0x80] sm:$0xff] }
 0x12d   :  { %632 = vst.msk [vmem:[#allocation2 + $0x88] sm:$0xff] %vm35_vm0, %v599_v4  ;;  %v890_v17 = vmul.f32 %v797_v14, %v666_v11  ;;  %v822_v4 = vpop.permute.xlu0 %821 }
 0x12e   :  { %1674 = vmatmul.msk.bf16.gmra.mxu2 %vm35_vm0, %v1732_v62 }
 0x130   :  { %v458_v7 = vpop.f32.mrf.mxu0  ;;  %v547_v9 = vpop.f32.mrf.mxu1 }
 0x131   :  { %v548_v10 = vadd.f32 %v547_v9, %v458_v7 }
 0x133   :  { %v600_v13 = vadd.f32 %v548_v10, %v262_v8 }
 0x134   :  { %v667_v15 = vld [vmem:[#allocation2 + $0x88] sm:$0xff] }
 0x135   :  { %633 = vst.msk [vmem:[#allocation2 + $0x90] sm:$0xff] %vm35_vm0, %v600_v13  ;;  %v891_v18 = vmul.f32 %v802_v12, %v667_v15 }
 0x137   :  { %v914_v19 = vpack.c.bf16 %v891_v18, %v890_v17 }
 0x138   :  { %v460_v20 = vpop.f32.mrf.mxu0  ;;  %v549_v22 = vpop.f32.mrf.mxu1 }
 0x139   :  { %v550_v23 = vadd.f32 %v549_v22, %v460_v20  ;;  %1694 = vmatmul.msk.bf16.gmra.mxu3 %vm35_vm0, %v914_v19  ;;  %v267_v19 = vld [vmem:[#allocation2 + $0xb8] sm:$0xff] }
 0x13b   :  { %v601_v24 = vadd.f32 %v550_v23, %v263_v21 }
 0x13c   :  { %v1260_v25 = vpop.f32.mrf.mxu3  ;;  %v668_v34 = vld [vmem:[#allocation2 + $0x90] sm:$0xff] }
 0x13d   :  { %634 = vst.msk [vmem:[#allocation2 + $0x98] sm:$0xff] %vm35_vm0, %v601_v24  ;;  %v1261_v27 = vadd.f32 %v1260_v25, %v1111_v40  ;;  %v892_v44 = vmul.f32 %v807_v36, %v668_v34 }
 0x13f   :  { %v1344_v37 = vmul.f32 %v2273_v28, %v1261_v27 }
 0x140   :  { %v463_v30 = vpop.f32.mrf.mxu0  ;;  %v552_v32 = vpop.f32.mrf.mxu1 }
 0x141   :  { %v553_v33 = vadd.f32 %v552_v32, %v463_v30  ;;  %v1380_v46 = vadd.f32 %v2283_v38, %v1344_v37  ;;  %v827_v37 = vpop.permute.xlu1 %826 }
 0x143   :  { %v602_v39 = vadd.f32 %v553_v33, %v264_v31  ;;  %v1412_v55 = vmax.f32 %v1380_v46, 0.0  ;;  %v1733_v31 = vld [vmem:[%s2420_s2 + $0x68] sm:$0xff]  ;;  %v268_v33 = vld [vmem:[#allocation2 + $0xc0] sm:$0xff] }
 0x144   :  { %v1262_v40 = vpop.f32.mrf.mxu3  ;;  %v669_v41 = vld [vmem:[#allocation2 + $0x98] sm:$0xff]  ;;  %1675 = vmatmul.msk.bf16.gmra.mxu2 %vm35_vm0, %v1733_v31 }
 0x145   :  { %635 = vst.msk [vmem:[#allocation2 + $0xa0] sm:$0xff] %vm35_vm0, %v602_v39  ;;  %v1263_v43 = vadd.f32 %v1262_v40, %v2245_v49  ;;  %v893_v45 = vmul.f32 %v812_v35, %v669_v41  ;;  %v2293_v49 = vpop.f32.mrf.mxu2  ;;  %v832_v39 = vpop.permute.xlu2 %831 }
 0x147   :  { %v1345_v47 = vmul.f32 %v2273_v28, %v1263_v43  ;;  %v915_v48 = vpack.c.bf16 %v893_v45, %v892_v44 }
 0x148   :  { %v465_v50 = vpop.f32.mrf.mxu0  ;;  %v554_v52 = vpop.f32.mrf.mxu1 }
 0x149   :  { %v1381_v53 = vadd.f32 %v2283_v38, %v1345_v47  ;;  %v555_v54 = vadd.f32 %v554_v52, %v465_v50  ;;  %1695 = vmatmul.msk.bf16.gmra.mxu3 %vm35_vm0, %v915_v48 }
 0x14b   :  { %v1413_v56 = vmax.f32 %v1381_v53, 0.0  ;;  %v603_v57 = vadd.f32 %v555_v54, %v265_v51  ;;  %v269_v53 = vld [vmem:[#allocation2 + $0xc8] sm:$0xff] }
 0x14c   :  { %v1265_v58 = vpop.f32.mrf.mxu3  ;;  %v670_v3 = vld [vmem:[#allocation2 + $0xa0] sm:$0xff] }
 0x14d   :  { %v1741_v59 = vpack.c.bf16 %v1413_v56, %v1412_v55  ;;  %636 = vst.msk [vmem:[#allocation2 + $0xa8] sm:$0xff] %vm35_vm0, %v603_v57  ;;  %v1266_v61 = vadd.f32 %v1265_v58, %v2252_v60  ;;  %v2302_v11 = vpop.f32.mrf.mxu2  ;;  %v894_v12 = vmul.f32 %v817_v6, %v670_v3 }
 0x14f   :  { %1742 = vst [vmem:[#allocation3] sm:$0xff] %v1741_v59   ;;  %v1346_v7 = vmul.f32 %v2273_v28, %v1266_v61 }
 0x150   :  { %v468_v63 = vpop.f32.mrf.mxu0  ;;  %v557_v1 = vpop.f32.mrf.mxu1 }
 0x151   :  { %v558_v2 = vadd.f32 %v557_v1, %v468_v63  ;;  %v1382_v14 = vadd.f32 %v2283_v38, %v1346_v7  ;;  %v842_v7 = vpop.permute.xlu1 %841 }
 0x153   :  { %v604_v8 = vadd.f32 %v558_v2, %v266_v0  ;;  %v1414_v23 = vmax.f32 %v1382_v14, 0.0  ;;  %v1734_v0 = vld [vmem:[%s2420_s2 + $0x70] sm:$0xff] }
 0x154   :  { %v1267_v9 = vpop.f32.mrf.mxu3  ;;  %v671_v10 = vld [vmem:[#allocation2 + $0xa8] sm:$0xff]  ;;  %v270_v2 = vld [vmem:[#allocation2 + $0xd0] sm:$0xff]  ;;  %1676 = vmatmul.msk.bf16.gmra.mxu2 %vm35_vm0, %v1734_v0 }
 0x155   :  { %637 = vst.msk [vmem:[#allocation2 + $0xb0] sm:$0xff] %vm35_vm0, %v604_v8  ;;  %v1268_v60 = vadd.f32 %v1267_v9, %v2256_v5  ;;  %v895_v13 = vmul.f32 %v822_v4, %v671_v10  ;;  %v2310_v5 = vpop.f32.mrf.mxu2  ;;  %v837_v10 = vpop.permute.xlu0 %836 }
 0x157   :  { %v1347_v15 = vmul.f32 %v2273_v28, %v1268_v60  ;;  %v916_v17 = vpack.c.bf16 %v895_v13, %v894_v12 }
 0x158   :  { %v470_v18 = vpop.f32.mrf.mxu0  ;;  %v559_v20 = vpop.f32.mrf.mxu1 }
 0x159   :  { %v1383_v21 = vadd.f32 %v2283_v38, %v1347_v15  ;;  %v560_v22 = vadd.f32 %v559_v20, %v470_v18  ;;  %1696 = vmatmul.msk.bf16.gmra.mxu3 %vm35_vm0, %v916_v17 }
 0x15b   :  { %v1415_v24 = vmax.f32 %v1383_v21, 0.0  ;;  %v605_v25 = vadd.f32 %v560_v22, %v267_v19  ;;  %v271_v21 = vld [vmem:[#allocation2 + $0xd8] sm:$0xff] }
 0x15c   :  { %v1270_v27 = vpop.f32.mrf.mxu3  ;;  %v672_v36 = vld [vmem:[#allocation2 + $0xb0] sm:$0xff] }
 0x15d   :  { %v1746_v29 = vpack.c.bf16 %v1415_v24, %v1414_v23  ;;  %638 = vst.msk [vmem:[#allocation2 + $0xb8] sm:$0xff] %vm35_vm0, %v605_v25  ;;  %v1271_v30 = vadd.f32 %v1270_v27, %v2263_v16  ;;  %v2319_v45 = vpop.f32.mrf.mxu2  ;;  %v896_v46 = vmul.f32 %v827_v37, %v672_v36 }
 0x15f   :  { %1818 = vst [vmem:[#allocation3 + $0x8] sm:$0xff] %v1746_v29   ;;  %v1348_v40 = vmul.f32 %v2273_v28, %v1271_v30 }
 0x160   :  { %v473_v32 = vpop.f32.mrf.mxu0  ;;  %v562_v34 = vpop.f32.mrf.mxu1 }
 0x161   :  { %v563_v35 = vadd.f32 %v562_v34, %v473_v32  ;;  %v1384_v48 = vadd.f32 %v2283_v38, %v1348_v40  ;;  %v847_v40 = vpop.permute.xlu2 %846 }
 0x163   :  { %v606_v41 = vadd.f32 %v563_v35, %v268_v33  ;;  %v1416_v57 = vmax.f32 %v1384_v48, 0.0  ;;  %v1735_v33 = vld [vmem:[%s2420_s2 + $0x78] sm:$0xff]  ;;  %v272_v35 = vld [vmem:[#allocation2 + $0xe0] sm:$0xff]  ;;  %s1871_s2 = smov [#allocation3]  }
 0x164   :  { %v1272_v43 = vpop.f32.mrf.mxu3  ;;  %v673_v44 = vld [vmem:[#allocation2 + $0xb8] sm:$0xff]  ;;  %1677 = vmatmul.msk.bf16.gmra.mxu2 %vm35_vm0, %v1735_v33  ;;  %s1512_s30 = sshll.u32 %s1871_s2, 4  ;;  %s1513_s30 = int_to_ptr.vmem [resolvable:$true] %s1512_s30 }
 0x165   :  { %639 = vst.msk [vmem:[#allocation2 + $0xc0] sm:$0xff] %vm35_vm0, %v606_v41  ;;  %v1273_v16 = vadd.f32 %v1272_v43, %v2267_v26  ;;  %v897_v47 = vmul.f32 %v832_v39, %v673_v44  ;;  %v2327_v26 = vpop.f32.mrf.mxu2  ;;  %v852_v44 = vpop.permute.xlu0 %851 }
 0x167   :  { %v1349_v50 = vmul.f32 %v2273_v28, %v1273_v16  ;;  %v917_v51 = vpack.c.bf16 %v897_v47, %v896_v46 }
 0x168   :  { %v475_v52 = vpop.f32.mrf.mxu0  ;;  %v564_v54 = vpop.f32.mrf.mxu1 }
 0x169   :  { %v1385_v55 = vadd.f32 %v2283_v38, %v1349_v50  ;;  %v565_v56 = vadd.f32 %v564_v54, %v475_v52  ;;  %1697 = vmatmul.msk.bf16.gmra.mxu3 %vm35_vm0, %v917_v51  ;;  %v273_v54 = vld [vmem:[#allocation2 + $0xe8] sm:$0xff] }
 0x16b   :  { %v1417_v58 = vmax.f32 %v1385_v55, 0.0  ;;  %v607_v59 = vadd.f32 %v565_v56, %v269_v53 }
 0x16c   :  { %v1275_v61 = vpop.f32.mrf.mxu3  ;;  %v674_v6 = vld [vmem:[#allocation2 + $0xc0] sm:$0xff] }
 0x16d   :  { %v1751_v62 = vpack.c.bf16 %v1417_v58, %v1416_v57  ;;  %640 = vst.msk [vmem:[#allocation2 + $0xc8] sm:$0xff] %vm35_vm0, %v607_v59  ;;  %v1276_v63 = vadd.f32 %v1275_v61, %v2285_v42  ;;  %v898_v13 = vmul.f32 %v837_v10, %v674_v6  ;;  %v2338_v15 = vpop.f32.mrf.mxu2 }
 0x16f   :  { %1819 = vst [vmem:[#allocation3 + $0x10] sm:$0xff] %v1751_v62   ;;  %v1350_v8 = vmul.f32 %v2273_v28, %v1276_v63 }
 0x170   :  { %v478_v1 = vpop.f32.mrf.mxu0  ;;  %v567_v3 = vpop.f32.mrf.mxu1 }
 0x171   :  { %v568_v4 = vadd.f32 %v567_v3, %v478_v1  ;;  %v1386_v17 = vadd.f32 %v2283_v38, %v1350_v8  ;;  %v862_v8 = vpop.permute.xlu2 %861 }
 0x173   :  { %v608_v9 = vadd.f32 %v568_v4, %v270_v2  ;;  %v1418_v25 = vmax.f32 %v1386_v17, 0.0  ;;  %v274_v2 = vld [vmem:[#allocation2 + $0xf0] sm:$0xff] }
 0x174   :  { %v1277_v60 = vpop.f32.mrf.mxu3  ;;  %v675_v12 = vld [vmem:[#allocation2 + $0xc8] sm:$0xff] }
 0x175   :  { %641 = vst.msk [vmem:[#allocation2 + $0xd0] sm:$0xff] %vm35_vm0, %v608_v9  ;;  %v1278_v42 = vadd.f32 %v1277_v60, %v2293_v49  ;;  %v899_v14 = vmul.f32 %v842_v7, %v675_v12  ;;  %v2346_v32 = vpop.f32.mrf.mxu2  ;;  %v857_v7 = vpop.permute.xlu1 %856 }
 0x177   :  { %v1351_v18 = vmul.f32 %v2273_v28, %v1278_v42  ;;  %v918_v19 = vpack.c.bf16 %v899_v14, %v898_v13 }
 0x178   :  { %v480_v20 = vpop.f32.mrf.mxu0  ;;  %v569_v22 = vpop.f32.mrf.mxu1 }
 0x179   :  { %v1387_v23 = vadd.f32 %v2283_v38, %v1351_v18  ;;  %v570_v24 = vadd.f32 %v569_v22, %v480_v20  ;;  %1698 = vmatmul.msk.bf16.gmra.mxu3 %vm35_vm0, %v918_v19 }
 0x17b   :  { %v1419_v27 = vmax.f32 %v1387_v23, 0.0  ;;  %v609_v49 = vadd.f32 %v570_v24, %v271_v21  ;;  %v275_v21 = vld [vmem:[#allocation2 + $0xf8] sm:$0xff] }
 0x17c   :  { %v1280_v29 = vpop.f32.mrf.mxu3  ;;  %v676_v39 = vld [vmem:[#allocation2 + $0xd0] sm:$0xff] }
 0x17d   :  { %v1756_v30 = vpack.c.bf16 %v1419_v27, %v1418_v25  ;;  %642 = vst.msk [vmem:[#allocation2 + $0xd8] sm:$0xff] %vm35_vm0, %v609_v49  ;;  %v1281_v31 = vadd.f32 %v1280_v29, %v2302_v11  ;;  %v900_v47 = vmul.f32 %v847_v40, %v676_v39  ;;  %v2359_v58 = vpop.f32.mrf.mxu2 }
 0x17f   :  { %1820 = vst [vmem:[#allocation3 + $0x18] sm:$0xff] %v1756_v30   ;;  %v1352_v41 = vmul.f32 %v2273_v28, %v1281_v31 }
 0x180   :  { %v483_v34 = vpop.f32.mrf.mxu0  ;;  %v572_v36 = vpop.f32.mrf.mxu1 }
 0x181   :  { %v573_v37 = vadd.f32 %v572_v36, %v483_v34  ;;  %v1388_v50 = vadd.f32 %v2283_v38, %v1352_v41  ;;  %v872_v34 = vpop.permute.xlu1 %871  ;;  %v867_v36 = vpop.permute.xlu0 %866 }
 0x183   :  { %v610_v43 = vadd.f32 %v573_v37, %v272_v35  ;;  %v1420_v59 = vmax.f32 %v1388_v50, 0.0 }
 0x184   :  { %v1282_v16 = vpop.f32.mrf.mxu3  ;;  %v677_v11 = vld [vmem:[#allocation2 + $0xd8] sm:$0xff] }
 0x185   :  { %643 = vst.msk [vmem:[#allocation2 + $0xe0] sm:$0xff] %vm35_vm0, %v610_v43  ;;  %v1283_v46 = vadd.f32 %v1282_v16, %v2310_v5  ;;  %v901_v48 = vmul.f32 %v852_v44, %v677_v11  ;;  %v1148_v42 = vpop.f32.mrf.mxu2 }
 0x187   :  { %v1353_v51 = vmul.f32 %v2273_v28, %v1283_v46  ;;  %v919_v52 = vpack.c.bf16 %v901_v48, %v900_v47 }
 0x188   :  { %v485_v53 = vpop.f32.mrf.mxu0  ;;  %v574_v55 = vpop.f32.mrf.mxu1 }
 0x189   :  { %v1389_v56 = vadd.f32 %v2283_v38, %v1353_v51  ;;  %v575_v57 = vadd.f32 %v574_v55, %v485_v53  ;;  %1699 = vmatmul.msk.bf16.gmra.mxu3 %vm35_vm0, %v919_v52 }
 0x18b   :  { %v1421_v61 = vmax.f32 %v1389_v56, 0.0  ;;  %v611_v5 = vadd.f32 %v575_v57, %v273_v54 }
 0x18c   :  { %v1285_v62 = vpop.f32.mrf.mxu3  ;;  %v678_v6 = vld [vmem:[#allocation2 + $0xe0] sm:$0xff] }
 0x18d   :  { %v1761_v63 = vpack.c.bf16 %v1421_v61, %v1420_v59  ;;  %644 = vst.msk [vmem:[#allocation2 + $0xe8] sm:$0xff] %vm35_vm0, %v611_v5  ;;  %v1286_v0 = vadd.f32 %v1285_v62, %v2319_v45  ;;  %v902_v14 = vmul.f32 %v857_v7, %v678_v6  ;;  %v1151_v30 = vpop.f32.mrf.mxu2 }
 0x18f   :  { %1821 = vst [vmem:[#allocation3 + $0x20] sm:$0xff] %v1761_v63   ;;  %v1354_v9 = vmul.f32 %v2273_v28, %v1286_v0 }
 0x190   :  { %v488_v1 = vpop.f32.mrf.mxu0  ;;  %v577_v3 = vpop.f32.mrf.mxu1 }
 0x191   :  { %v578_v4 = vadd.f32 %v577_v3, %v488_v1  ;;  %v1390_v45 = vadd.f32 %v2283_v38, %v1354_v9 }
 0x193   :  { %v612_v10 = vadd.f32 %v578_v4, %v274_v2  ;;  %v1422_v25 = vmax.f32 %v1390_v45, 0.0 }
 0x194   :  { %v1287_v60 = vpop.f32.mrf.mxu3  ;;  %v679_v12 = vld [vmem:[#allocation2 + $0xe8] sm:$0xff] }
 0x195   :  { %645 = vst.msk [vmem:[#allocation2 + $0xf0] sm:$0xff] %vm35_vm0, %v612_v10  ;;  %v1288_v13 = vadd.f32 %v1287_v60, %v2327_v26  ;;  %v903_v17 = vmul.f32 %v862_v8, %v679_v12  ;;  %v1153_v46 = vpop.f32.mrf.mxu2 }
 0x197   :  { %v1355_v18 = vmul.f32 %v2273_v28, %v1288_v13  ;;  %v920_v19 = vpack.c.bf16 %v903_v17, %v902_v14 }
 0x198   :  { %v490_v20 = vpop.f32.mrf.mxu0  ;;  %v579_v22 = vpop.f32.mrf.mxu1 }
 0x199   :  { %v1391_v23 = vadd.f32 %v2283_v38, %v1355_v18  ;;  %v580_v24 = vadd.f32 %v579_v22, %v490_v20  ;;  %1700 = vmatmul.msk.bf16.gmra.mxu3 %vm35_vm0, %v920_v19 }
 0x19b   :  { %v1423_v27 = vmax.f32 %v1391_v23, 0.0  ;;  %v613_v49 = vadd.f32 %v580_v24, %v275_v21 }
 0x19c   :  { %v1290_v29 = vpop.f32.mrf.mxu3  ;;  %v680_v33 = vld [vmem:[#allocation2 + $0xf0] sm:$0xff] }
 0x19d   :  { %v1766_v26 = vpack.c.bf16 %v1423_v27, %v1422_v25  ;;  %646 = vst.msk [vmem:[#allocation2 + $0xf8] sm:$0xff] %vm35_vm0, %v613_v49  ;;  %v1291_v31 = vadd.f32 %v1290_v29, %v2338_v15  ;;  %v904_v41 = vmul.f32 %v867_v36, %v680_v33 }
 0x19f   :  { %1822 = vst [vmem:[#allocation3 + $0x28] sm:$0xff] %v1766_v26   ;;  %v1356_v35 = vmul.f32 %v2273_v28, %v1291_v31 }
 0x1a1   :  { %v1392_v44 = vadd.f32 %v2283_v38, %v1356_v35 }
 0x1a3   :  { %v1424_v15 = vmax.f32 %v1392_v44, 0.0 }
 0x1a4   :  { %v1292_v37 = vpop.f32.mrf.mxu3  ;;  %v681_v39 = vld [vmem:[#allocation2 + $0xf8] sm:$0xff] }
 0x1a5   :  { %v1293_v40 = vadd.f32 %v1292_v37, %v2346_v32  ;;  %v905_v43 = vmul.f32 %v872_v34, %v681_v39  ;;  %v1156_v32 = vpop.f32.mrf.mxu2 }
 0x1a7   :  { %v1357_v16 = vmul.f32 %v2273_v28, %v1293_v40  ;;  %v921_v11 = vpack.c.bf16 %v905_v43, %v904_v41 }
 0x1a9   :  { %v1393_v47 = vadd.f32 %v2283_v38, %v1357_v16  ;;  %1701 = vmatmul.msk.bf16.gmra.mxu3 %vm35_vm0, %v921_v11 }
 0x1ab   :  { %v1425_v48 = vmax.f32 %v1393_v47, 0.0 }
 0x1ac   :  { %v1295_v50 = vpop.f32.mrf.mxu3 }
 0x1ad   :  { %v1771_v51 = vpack.c.bf16 %v1425_v48, %v1424_v15  ;;  %v1296_v52 = vadd.f32 %v1295_v50, %v2359_v58  ;;  %v1158_v63 = vpop.f32.mrf.mxu2 }
 0x1af   :  { %1823 = vst [vmem:[#allocation3 + $0x30] sm:$0xff] %v1771_v51   ;;  %v1358_v53 = vmul.f32 %v2273_v28, %v1296_v52 }
 0x1b1   :  { %v1394_v56 = vadd.f32 %v2283_v38, %v1358_v53 }
 0x1b3   :  { %v1426_v61 = vmax.f32 %v1394_v56, 0.0 }
 0x1b4   :  { %v1297_v54 = vpop.f32.mrf.mxu3 }
 0x1b5   :  { %v1298_v55 = vadd.f32 %v1297_v54, %v1148_v42  ;;  %v1161_v4 = vpop.f32.mrf.mxu2 }
 0x1b7   :  { %v1359_v57 = vmul.f32 %v2273_v28, %v1298_v55 }
 0x1b9   :  { %v1395_v59 = vadd.f32 %v2283_v38, %v1359_v57 }
 0x1bb   :  { %v1427_v5 = vmax.f32 %v1395_v59, 0.0 }
 0x1bc   :  { %v1300_v62 = vpop.f32.mrf.mxu3 }
 0x1bd   :  { %v1776_v0 = vpack.c.bf16 %v1427_v5, %v1426_v61  ;;  %v1301_v1 = vadd.f32 %v1300_v62, %v1151_v30  ;;  %v1163_v13 = vpop.f32.mrf.mxu2 }
 0x1bf   :  { %1824 = vst [vmem:[#allocation3 + $0x38] sm:$0xff] %v1776_v0   ;;  %v1360_v58 = vmul.f32 %v2273_v28, %v1301_v1 }
 0x1c1   :  { %v1396_v6 = vadd.f32 %v2283_v38, %v1360_v58 }
 0x1c3   :  { %v1428_v9 = vmax.f32 %v1396_v6, 0.0 }
 0x1c4   :  { %v1302_v2 = vpop.f32.mrf.mxu3 }
 0x1c5   :  { %v1303_v3 = vadd.f32 %v1302_v2, %v1153_v46  ;;  %v1166_v21 = vpop.f32.mrf.mxu2 }
 0x1c7   :  { %v1361_v7 = vmul.f32 %v2273_v28, %v1303_v3 }
 0x1c9   :  { %v1397_v8 = vadd.f32 %v2283_v38, %v1361_v7 }
 0x1cb   :  { %v1429_v10 = vmax.f32 %v1397_v8, 0.0 }
 0x1cc   :  { %v1305_v60 = vpop.f32.mrf.mxu3 }
 0x1cd   :  { %v1781_v12 = vpack.c.bf16 %v1429_v10, %v1428_v9  ;;  %v1306_v42 = vadd.f32 %v1305_v60, %v1156_v32  ;;  %v1168_v26 = vpop.f32.mrf.mxu2 }
 0x1cf   :  { %1825 = vst [vmem:[#allocation3 + $0x40] sm:$0xff] %v1781_v12   ;;  %v1362_v14 = vmul.f32 %v2273_v28, %v1306_v42 }
 0x1d1   :  { %v1398_v18 = vadd.f32 %v2283_v38, %v1362_v14 }
 0x1d3   :  { %v1430_v22 = vmax.f32 %v1398_v18, 0.0 }
 0x1d4   :  { %v1307_v17 = vpop.f32.mrf.mxu3 }
 0x1d5   :  { %v1308_v45 = vadd.f32 %v1307_v17, %v1158_v63  ;;  %v1171_v40 = vpop.f32.mrf.mxu2 }
 0x1d7   :  { %v1363_v19 = vmul.f32 %v2273_v28, %v1308_v45 }
 0x1d9   :  { %v1399_v20 = vadd.f32 %v2283_v38, %v1363_v19 }
 0x1db   :  { %v1431_v23 = vmax.f32 %v1399_v20, 0.0 }
 0x1dc   :  { %v1310_v24 = vpop.f32.mrf.mxu3 }
 0x1dd   :  { %v1786_v25 = vpack.c.bf16 %v1431_v23, %v1430_v22  ;;  %v1311_v27 = vadd.f32 %v1310_v24, %v1161_v4  ;;  %v1173_v47 = vpop.f32.mrf.mxu2 }
 0x1df   :  { %1826 = vst [vmem:[#allocation3 + $0x48] sm:$0xff] %v1786_v25   ;;  %v1364_v49 = vmul.f32 %v2273_v28, %v1311_v27 }
 0x1e1   :  { %v1400_v31 = vadd.f32 %v2283_v38, %v1364_v49 }
 0x1e3   :  { %v1432_v35 = vmax.f32 %v1400_v31, 0.0 }
 0x1e4   :  { %v1312_v29 = vpop.f32.mrf.mxu3 }
 0x1e5   :  { %v1313_v30 = vadd.f32 %v1312_v29, %v1163_v13  ;;  %v1176_v53 = vpop.f32.mrf.mxu2 }
 0x1e7   :  { %v1365_v33 = vmul.f32 %v2273_v28, %v1313_v30 }
 0x1e9   :  { %v1401_v34 = vadd.f32 %v2283_v38, %v1365_v33 }
 0x1eb   :  { %v1433_v36 = vmax.f32 %v1401_v34, 0.0 }
 0x1ec   :  { %v1315_v37 = vpop.f32.mrf.mxu3 }
 0x1ed   :  { %v1791_v39 = vpack.c.bf16 %v1433_v36, %v1432_v35  ;;  %v1316_v41 = vadd.f32 %v1315_v37, %v1166_v21  ;;  %v1178_v63 = vpop.f32.mrf.mxu2 }
 0x1ef   :  { %1827 = vst [vmem:[#allocation3 + $0x50] sm:$0xff] %v1791_v39   ;;  %v1366_v43 = vmul.f32 %v2273_v28, %v1316_v41 }
 0x1f1   :  { %v1402_v11 = vadd.f32 %v2283_v38, %v1366_v43 }
 0x1f3   :  { %v1434_v48 = vmax.f32 %v1402_v11, 0.0 }
 0x1f4   :  { %v1317_v44 = vpop.f32.mrf.mxu3 }
 0x1f5   :  { %v1318_v16 = vadd.f32 %v1317_v44, %v1168_v26  ;;  %v1181_v6 = vpop.f32.mrf.mxu2 }
 0x1f7   :  { %v1367_v46 = vmul.f32 %v2273_v28, %v1318_v16 }
 0x1f9   :  { %v1403_v15 = vadd.f32 %v2283_v38, %v1367_v46 }
 0x1fb   :  { %v1435_v50 = vmax.f32 %v1403_v15, 0.0 }
 0x1fc   :  { %v1320_v51 = vpop.f32.mrf.mxu3 }
 0x1fd   :  { %v1796_v52 = vpack.c.bf16 %v1435_v50, %v1434_v48  ;;  %v1321_v32 = vadd.f32 %v1320_v51, %v1171_v40  ;;  %v1183_v14 = vpop.f32.mrf.mxu2 }
 0x1ff   :  { %1828 = vst [vmem:[#allocation3 + $0x58] sm:$0xff] %v1796_v52   ;;  %v1368_v54 = vmul.f32 %v2273_v28, %v1321_v32 }
 0x201   :  { %v1404_v57 = vadd.f32 %v2283_v38, %v1368_v54 }
 0x203   :  { %v1436_v5 = vmax.f32 %v1404_v57, 0.0 }
 0x204   :  { %v1322_v55 = vpop.f32.mrf.mxu3 }
 0x205   :  { %v1323_v56 = vadd.f32 %v1322_v55, %v1173_v47  ;;  %v1186_v22 = vpop.f32.mrf.mxu2 }
 0x207   :  { %v1369_v59 = vmul.f32 %v2273_v28, %v1323_v56 }
 0x209   :  { %v1405_v61 = vadd.f32 %v2283_v38, %v1369_v59 }
 0x20b   :  { %v1437_v62 = vmax.f32 %v1405_v61, 0.0 }
 0x20c   :  { %v1325_v0 = vpop.f32.mrf.mxu3 }
 0x20d   :  { %v1801_v1 = vpack.c.bf16 %v1437_v62, %v1436_v5  ;;  %v1326_v58 = vadd.f32 %v1325_v0, %v1176_v53  ;;  %v1188_v26 = vpop.f32.mrf.mxu2 }
 0x20f   :  { %1829 = vst [vmem:[#allocation3 + $0x60] sm:$0xff] %v1801_v1   ;;  %v1370_v2 = vmul.f32 %v2273_v28, %v1326_v58 }
 0x211   :  { %v1406_v7 = vadd.f32 %v2283_v38, %v1370_v2 }
 0x213   :  { %v1438_v10 = vmax.f32 %v1406_v7, 0.0 }
 0x214   :  { %v1327_v3 = vpop.f32.mrf.mxu3 }
 0x215   :  { %v1328_v4 = vadd.f32 %v1327_v3, %v1178_v63 }
 0x217   :  { %v1371_v8 = vmul.f32 %v2273_v28, %v1328_v4 }
 0x219   :  { %v1407_v9 = vadd.f32 %v2283_v38, %v1371_v8 }
 0x21b   :  { %v1439_v60 = vmax.f32 %v1407_v9, 0.0 }
 0x21c   :  { %v1330_v12 = vpop.f32.mrf.mxu3 }
 0x21d   :  { %v1806_v42 = vpack.c.bf16 %v1439_v60, %v1438_v10  ;;  %v1331_v13 = vadd.f32 %v1330_v12, %v1181_v6 }
 0x21f   :  { %1830 = vst [vmem:[#allocation3 + $0x68] sm:$0xff] %v1806_v42   ;;  %v1372_v17 = vmul.f32 %v2273_v28, %v1331_v13 }
 0x221   :  { %v1408_v19 = vadd.f32 %v2283_v38, %v1372_v17 }
 0x223   :  { %v1440_v23 = vmax.f32 %v1408_v19, 0.0 }
 0x224   :  { %v1332_v45 = vpop.f32.mrf.mxu3 }
 0x225   :  { %v1333_v18 = vadd.f32 %v1332_v45, %v1183_v14 }
 0x227   :  { %v1373_v20 = vmul.f32 %v2273_v28, %v1333_v18 }
 0x229   :  { %v1409_v21 = vadd.f32 %v2283_v38, %v1373_v20 }
 0x22b   :  { %v1441_v24 = vmax.f32 %v1409_v21, 0.0 }
 0x22c   :  { %v1335_v25 = vpop.f32.mrf.mxu3 }
 0x22d   :  { %v1811_v27 = vpack.c.bf16 %v1441_v24, %v1440_v23  ;;  %v1336_v49 = vadd.f32 %v1335_v25, %v1186_v22 }
 0x22f   :  { %1831 = vst [vmem:[#allocation3 + $0x70] sm:$0xff] %v1811_v27   ;;  %v1374_v29 = vmul.f32 %v2273_v28, %v1336_v49 }
 0x231   :  { %v1410_v33 = vadd.f32 %v2283_v38, %v1374_v29 }
 0x233   :  { %v1442_v36 = vmax.f32 %v1410_v33, 0.0 }
 0x234   :  { %v1337_v30 = vpop.f32.mrf.mxu3 }
 0x235   :  { %v1338_v31 = vadd.f32 %v1337_v30, %v1188_v26 }
 0x237   :  { %v1375_v34 = vmul.f32 %v2273_v28, %v1338_v31 }
 0x239   :  { %v1411_v35 = vadd.f32 %v2283_v38, %v1375_v34 }
 0x23b   :  { %v1443_v37 = vmax.f32 %v1411_v35, 0.0 }
 0x23d   :  { %v1816_v39 = vpack.c.bf16 %v1443_v37, %v1442_v36 }
 0x23f   :  { %1832 = vst [vmem:[#allocation3 + $0x78] sm:$0xff] %v1816_v39  }
 0x240   :  { %1520 = dma.vmem_to_hbm [thread:$0]  %s1513_s30, 2048, %s1515_s10, [#allocation4], %s1872_s11, %s1872_s11, %s1873_s12  }
 0x241   :  { %1867 = dma.done.wait [#allocation4], 2048  }
 0x242   :  { %1868 = vsyncadd [#allocation4], 4294965248 }
 0x243   :  { %1525 = vsyncpa [#allocation4], 1 }

</bundles_post_ra>
